<compile_context>
chip_gen: v5e
topology: v5e:2x2
jax: 0.10.0
libtpu: 0.0.40
codegen_flags: <defaults>
</compile_context>

<pallas_src>
import functools

import jax
import jax.numpy as jnp
from jax.experimental import pallas as pl
from jax.experimental.pallas import tpu as pltpu


def encoder_kernel(x_ref, m_ref, w_ref, b_ref, lwz_ref, lwd_ref, lb_ref, out_ref):
    """One H row-tile of the ConvCNP grid encoder.

    x_ref   : (C, tH+K-1, W+K-1) f32  VMEM   halo'd, zero-padded input tile
    m_ref   : (Cm, tH+K-1, W+K-1) f32 VMEM   mask tile, Cm in {1, C}
    w_ref   : (C, K, K)  f32 VMEM            depthwise weights (already exp()'d)
    b_ref   : (C, 1, 1)  f32 VMEM            conv bias
    lwz_ref : (E, C)     f32 VMEM            Linear weight, z half
    lwd_ref : (E, C)     f32 VMEM            Linear weight, density half
    lb_ref  : (E, 1)     f32 VMEM            Linear bias
    out_ref : (E, tH*W)  f32 VMEM            lane-dense output block
    """
    C, tHp, Wp = x_ref.shape
    K = w_ref.shape[1]
    tH = tHp - (K - 1)
    W = Wp - (K - 1)

    x = x_ref[...]
    m = m_ref[...]
    if m.shape[0] != C:                       # single-plane mask -> hoisted broadcast
        m = jnp.broadcast_to(m, (C, tHp, Wp))
    xc = x * m                                # x_c = x * mask (zeros stay zero in the pad)
    w = w_ref[...]                            # already exp()'d (AbsConv)

    # Depthwise KxK conv via shift-and-accumulate (K*K small, unrolled).
    z = jnp.zeros((C, tH, W), jnp.float32)
    d = jnp.zeros((C, tH, W), jnp.float32)
    for di in range(K):
        for dj in range(K):
            wk = w[:, di:di + 1, dj:dj + 1]                 # (C,1,1) per-channel tap
            z = z + wk * xc[:, di:di + tH, dj:dj + W]
            d = d + wk * m[:, di:di + tH, dj:dj + W]
    b = b_ref[...]                                          # conv bias on both convs
    z = z + b
    d = d + b

    # z_c = z_c / clamp(density_c, 1e-8): explicit EUP reciprocal + VPU multiply.
    z = z * pl.reciprocal(jnp.maximum(d, 1e-8), approx=False)

    # Resizer: Linear(2C -> E) per pixel as MXU matmuls on the flattened
    # (C, tH*W) tiles (lane-dense, tH*W is a multiple of 128).
    zf = z.reshape(C, tH * W)
    df = d.reshape(C, tH * W)
    out = (jnp.dot(lwz_ref[...], zf, preferred_element_type=jnp.float32)
           + jnp.dot(lwd_ref[...], df, preferred_element_type=jnp.float32)
           + lb_ref[...])
    out_ref[...] = out.astype(out_ref.dtype)


def _pick_tile_h(H, W, C, pad, budget_bytes=1 << 20):
    """Largest divisor of H whose tile is lane-friendly and fits a VMEM budget."""
    for t in range(H, 0, -1):
        if H % t:
            continue
        if (t * W) % 128 != 0 and t != H:
            continue
        tile_bytes = 4 * (C + 1) * (t + 2 * pad) * (W + 2 * pad) * 2  # x+mask, 2x buffered
        if tile_bytes <= budget_bytes:
            return t
    return H


def grid_convcnp_encoder(x, mask_c, conv_w, conv_b, lin_w, lin_b, *,
                         kernel_size, tile_h=None):
    """Wrapper: mask/pad handling, halo'd row tiling, pallas_call."""
    C, H, W = x.shape
    assert x.ndim == 3
    assert conv_w.shape == (C, kernel_size, kernel_size)
    assert kernel_size % 2 == 1, "padding='same' implemented for odd kernels"

    if mask_c.ndim == 2:                       # module's unsqueeze(0).repeat(C,1,1) path:
        mask_c = mask_c[None]                  # keep a single plane, broadcast in-kernel
    assert mask_c.ndim == 3 and mask_c.shape[1:] == (H, W)
    Cm = mask_c.shape[0]
    assert Cm in (1, C)

    E = lin_w.shape[0]
    assert lin_w.shape == (E, 2 * C)

    pad = kernel_size // 2
    if tile_h is None:
        tile_h = _pick_tile_h(H, W, C, pad)
    assert H % tile_h == 0
    assert (tile_h * W) % 128 == 0 or tile_h == H
    n_tiles = H // tile_h
    tHp = tile_h + 2 * pad
    Wp = W + 2 * pad

    # 'same' zero padding + overlapping (halo'd) row tiles, built once on the XLA
    # side so the kernel gets plain non-overlapping BlockSpec blocks (auto
    # double-buffered, parallel-safe).
    # TODO(synk): for very large grids move the halo/padding in-kernel via
    # manual DMA (pl.ANY + pltpu.make_async_copy) to avoid this extra HBM pass.
    xpadded = jnp.pad(x.astype(jnp.float32), ((0, 0), (pad, pad), (pad, pad)))
    mpadded = jnp.pad(mask_c.astype(jnp.float32), ((0, 0), (pad, pad), (pad, pad)))
    rows = (jnp.arange(n_tiles, dtype=jnp.int32)[:, None] * tile_h
            + jnp.arange(tHp, dtype=jnp.int32)[None, :])            # (n_tiles, tHp)
    x_tiles = jnp.moveaxis(jnp.take(xpadded, rows, axis=1), 1, 0)   # (n_tiles, C, tHp, Wp)
    m_tiles = jnp.moveaxis(jnp.take(mpadded, rows, axis=1), 1, 0)   # (n_tiles, Cm, tHp, Wp)

    # AbsConv: exp() the weights once here (same math as weight.exp() per forward).
    w_exp = jnp.exp(conv_w).astype(jnp.float32)
    b3 = conv_b.reshape(C, 1, 1).astype(jnp.float32)
    lw = lin_w.astype(jnp.float32)
    lw_z = lw[:, :C]
    lw_d = lw[:, C:]
    lb2 = lin_b.reshape(E, 1).astype(jnp.float32)

    flat_out = pl.pallas_call(
        encoder_kernel,
        out_shape=jax.ShapeDtypeStruct((E, H * W), jnp.float32),
        grid=(n_tiles,),
        in_specs=[
            pl.BlockSpec((None, C, tHp, Wp), lambda i: (i, 0, 0, 0)),    # x tile
            pl.BlockSpec((None, Cm, tHp, Wp), lambda i: (i, 0, 0, 0)),   # mask tile
            pl.BlockSpec((C, kernel_size, kernel_size), lambda i: (0, 0, 0)),
            pl.BlockSpec((C, 1, 1), lambda i: (0, 0, 0)),
            pl.BlockSpec((E, C), lambda i: (0, 0)),
            pl.BlockSpec((E, C), lambda i: (0, 0)),
            pl.BlockSpec((E, 1), lambda i: (0, 0)),
        ],
        out_specs=pl.BlockSpec((E, tile_h * W), lambda i: (0, i)),       # lane-dense
        compiler_params=pltpu.CompilerParams(
            dimension_semantics=("parallel",),       # 2 TCs on v7x; no-op on v5e/v6e
            vmem_limit_bytes=32 * 1024 * 1024,       # headroom even on v7x's 64 MiB
        ),
    )(x_tiles, m_tiles, w_exp, b3, lw_z, lw_d, lb2)

    return flat_out.reshape(E, H, W)


def reference(x, mask_c, conv_w, conv_b, lin_w, lin_b):
    """Pure-JAX reference (lax depthwise conv) mirroring the PyTorch forward."""
    C, H, W = x.shape
    if mask_c.ndim == 2:
        mask_c = jnp.broadcast_to(mask_c[None], (C, H, W))
    xc = x * mask_c
    w = jnp.exp(conv_w)[:, None, :, :]                      # (C, 1, K, K)  OIHW

    def dwconv(inp):
        out = jax.lax.conv_general_dilated(
            inp[None].astype(jnp.float32), w.astype(jnp.float32),
            window_strides=(1, 1), padding="SAME",
            dimension_numbers=("NCHW", "OIHW", "NCHW"),
            feature_group_count=C,
            precision=jax.lax.Precision.HIGHEST)[0]
        return out + conv_b[:, None, None]

    z = dwconv(xc)
    d = dwconv(mask_c)
    z = z / jnp.maximum(d, 1e-8)
    zcat = jnp.concatenate([z, d], axis=0)                  # (2C, H, W)
    out = jnp.einsum("ec,chw->ehw", lin_w, zcat,
                     precision=jax.lax.Precision.HIGHEST) + lin_b[:, None, None]
    return out


if __name__ == "__main__":
    # Small shapes consistent with the module: y_dim=4 channels, 16x16 grid,
    # 3x3 depthwise conv, embedded_dim=8.  tile_h=8 -> 2-step grid, 128-lane blocks.
    y_dim, H, W = 4, 16, 16
    K = 3
    embedded_dim = 8

    key = jax.random.PRNGKey(0)
    k1, k2, k3, k4, k5, k6, k7 = jax.random.split(key, 7)

    x = jax.random.normal(k1, (y_dim, H, W), dtype=jnp.float32)
    # mask given as (H, W) to exercise the unsqueeze/repeat broadcast path
    mask_c = (jax.random.uniform(k2, (H, W)) > 0.5).astype(jnp.float32)

    conv_w = 0.1 * jax.random.normal(k3, (y_dim, K, K), dtype=jnp.float32)   # depthwise (C,K,K)
    conv_b = 0.1 * jax.random.normal(k4, (y_dim,), dtype=jnp.float32)
    lin_w = jax.random.normal(k5, (embedded_dim, 2 * y_dim), dtype=jnp.float32) / jnp.sqrt(2.0 * y_dim)
    lin_b = 0.1 * jax.random.normal(k6, (embedded_dim,), dtype=jnp.float32)

    run = jax.jit(functools.partial(grid_convcnp_encoder, kernel_size=K, tile_h=8))

    out = jax.block_until_ready(run(x, mask_c, conv_w, conv_b, lin_w, lin_b))
    ref = jax.block_until_ready(reference(x, mask_c, conv_w, conv_b, lin_w, lin_b))
    assert out.shape == (embedded_dim, H, W), out.shape
    assert jnp.allclose(out, ref, atol=1e-4, rtol=1e-4), float(jnp.max(jnp.abs(out - ref)))

    # Also exercise the per-channel (3-D) mask path.
    mask3 = (jax.random.uniform(k7, (y_dim, H, W)) > 0.3).astype(jnp.float32)
    out3 = jax.block_until_ready(run(x, mask3, conv_w, conv_b, lin_w, lin_b))
    ref3 = jax.block_until_ready(reference(x, mask3, conv_w, conv_b, lin_w, lin_b))
    assert jnp.allclose(out3, ref3, atol=1e-4, rtol=1e-4), float(jnp.max(jnp.abs(out3 - ref3)))

    print("KERNEL_OK")
</pallas_src>

<mosaic_0001>
module attributes {stable_mosaic.version = 11 : i64} {
  func.func @encoder_kernel(%arg0: i32, %arg1: memref<1x4x10x18xf32, #tpu.memory_space<vmem>>, %arg2: memref<1x1x10x18xf32, #tpu.memory_space<vmem>>, %arg3: memref<4x3x3xf32, #tpu.memory_space<vmem>>, %arg4: memref<4x1x1xf32, #tpu.memory_space<vmem>>, %arg5: memref<8x4xf32, #tpu.memory_space<vmem>>, %arg6: memref<8x4xf32, #tpu.memory_space<vmem>>, %arg7: memref<8x1xf32, #tpu.memory_space<vmem>>, %arg8: memref<8x128xf32, #tpu.memory_space<vmem>>) attributes {dimension_semantics = [#tpu.dimension_semantics<parallel>], iteration_bounds = array<i64: 2>, scalar_prefetch = 0 : i64, scratch_operands = 0 : i64, tpu.core_type = #tpu.core_type<tc>, window_params = [{transform_indices = @transform_0, window_bounds = array<i64: 1, 4, 10, 18>}, {transform_indices = @transform_1, window_bounds = array<i64: 1, 1, 10, 18>}, {pipeline_mode = #tpu.pipeline_mode<synchronous>, transform_indices = @transform_2, window_bounds = array<i64: 4, 3, 3>}, {pipeline_mode = #tpu.pipeline_mode<synchronous>, transform_indices = @transform_3, window_bounds = array<i64: 4, 1, 1>}, {pipeline_mode = #tpu.pipeline_mode<synchronous>, transform_indices = @transform_4, window_bounds = array<i64: 8, 4>}, {pipeline_mode = #tpu.pipeline_mode<synchronous>, transform_indices = @transform_5, window_bounds = array<i64: 8, 4>}, {pipeline_mode = #tpu.pipeline_mode<synchronous>, transform_indices = @transform_6, window_bounds = array<i64: 8, 1>}, {transform_indices = @transform_7, window_bounds = array<i64: 8, 128>}]} {
    %c0 = arith.constant 0 : index
    %c0_0 = arith.constant 0 : index
    %c0_1 = arith.constant 0 : index
    %c0_2 = arith.constant 0 : index
    %0 = vector.load %arg1[%c0, %c0_0, %c0_1, %c0_2] : memref<1x4x10x18xf32, #tpu.memory_space<vmem>>, vector<1x4x10x18xf32>
    %1 = vector.shape_cast %0 : vector<1x4x10x18xf32> to vector<4x10x18xf32>
    %c0_3 = arith.constant 0 : index
    %c0_4 = arith.constant 0 : index
    %c0_5 = arith.constant 0 : index
    %c0_6 = arith.constant 0 : index
    %2 = vector.load %arg2[%c0_3, %c0_4, %c0_5, %c0_6] : memref<1x1x10x18xf32, #tpu.memory_space<vmem>>, vector<1x1x10x18xf32>
    %3 = vector.shape_cast %2 : vector<1x1x10x18xf32> to vector<1x10x18xf32>
    %4 = vector.shape_cast %3 : vector<1x10x18xf32> to vector<1x10x18xf32>
    %5 = vector.broadcast %4 : vector<1x10x18xf32> to vector<4x10x18xf32>
    %6 = arith.mulf %1, %5 : vector<4x10x18xf32>
    %c0_7 = arith.constant 0 : index
    %c0_8 = arith.constant 0 : index
    %c0_9 = arith.constant 0 : index
    %7 = vector.load %arg3[%c0_7, %c0_8, %c0_9] : memref<4x3x3xf32, #tpu.memory_space<vmem>>, vector<4x3x3xf32>
    %cst = arith.constant 0.000000e+00 : f32
    %8 = vector.broadcast %cst : f32 to vector<4x8x16xf32>
    %cst_10 = arith.constant 0.000000e+00 : f32
    %9 = vector.broadcast %cst_10 : f32 to vector<4x8x16xf32>
    %10 = vector.extract_strided_slice %7 {offsets = [0, 0, 0], sizes = [4, 1, 1], strides = [1, 1, 1]} : vector<4x3x3xf32> to vector<4x1x1xf32>
    %11 = vector.extract_strided_slice %6 {offsets = [0, 0, 0], sizes = [4, 8, 16], strides = [1, 1, 1]} : vector<4x10x18xf32> to vector<4x8x16xf32>
    %12 = vector.broadcast %10 : vector<4x1x1xf32> to vector<4x8x16xf32>
    %13 = arith.mulf %12, %11 : vector<4x8x16xf32>
    %14 = arith.addf %8, %13 : vector<4x8x16xf32>
    %15 = vector.extract_strided_slice %5 {offsets = [0, 0, 0], sizes = [4, 8, 16], strides = [1, 1, 1]} : vector<4x10x18xf32> to vector<4x8x16xf32>
    %16 = vector.broadcast %10 : vector<4x1x1xf32> to vector<4x8x16xf32>
    %17 = arith.mulf %16, %15 : vector<4x8x16xf32>
    %18 = arith.addf %9, %17 : vector<4x8x16xf32>
    %19 = vector.extract_strided_slice %7 {offsets = [0, 0, 1], sizes = [4, 1, 1], strides = [1, 1, 1]} : vector<4x3x3xf32> to vector<4x1x1xf32>
    %20 = vector.extract_strided_slice %6 {offsets = [0, 0, 1], sizes = [4, 8, 16], strides = [1, 1, 1]} : vector<4x10x18xf32> to vector<4x8x16xf32>
    %21 = vector.broadcast %19 : vector<4x1x1xf32> to vector<4x8x16xf32>
    %22 = arith.mulf %21, %20 : vector<4x8x16xf32>
    %23 = arith.addf %14, %22 : vector<4x8x16xf32>
    %24 = vector.extract_strided_slice %5 {offsets = [0, 0, 1], sizes = [4, 8, 16], strides = [1, 1, 1]} : vector<4x10x18xf32> to vector<4x8x16xf32>
    %25 = vector.broadcast %19 : vector<4x1x1xf32> to vector<4x8x16xf32>
    %26 = arith.mulf %25, %24 : vector<4x8x16xf32>
    %27 = arith.addf %18, %26 : vector<4x8x16xf32>
    %28 = vector.extract_strided_slice %7 {offsets = [0, 0, 2], sizes = [4, 1, 1], strides = [1, 1, 1]} : vector<4x3x3xf32> to vector<4x1x1xf32>
    %29 = vector.extract_strided_slice %6 {offsets = [0, 0, 2], sizes = [4, 8, 16], strides = [1, 1, 1]} : vector<4x10x18xf32> to vector<4x8x16xf32>
    %30 = vector.broadcast %28 : vector<4x1x1xf32> to vector<4x8x16xf32>
    %31 = arith.mulf %30, %29 : vector<4x8x16xf32>
    %32 = arith.addf %23, %31 : vector<4x8x16xf32>
    %33 = vector.extract_strided_slice %5 {offsets = [0, 0, 2], sizes = [4, 8, 16], strides = [1, 1, 1]} : vector<4x10x18xf32> to vector<4x8x16xf32>
    %34 = vector.broadcast %28 : vector<4x1x1xf32> to vector<4x8x16xf32>
    %35 = arith.mulf %34, %33 : vector<4x8x16xf32>
    %36 = arith.addf %27, %35 : vector<4x8x16xf32>
    %37 = vector.extract_strided_slice %7 {offsets = [0, 1, 0], sizes = [4, 1, 1], strides = [1, 1, 1]} : vector<4x3x3xf32> to vector<4x1x1xf32>
    %38 = vector.extract_strided_slice %6 {offsets = [0, 1, 0], sizes = [4, 8, 16], strides = [1, 1, 1]} : vector<4x10x18xf32> to vector<4x8x16xf32>
    %39 = vector.broadcast %37 : vector<4x1x1xf32> to vector<4x8x16xf32>
    %40 = arith.mulf %39, %38 : vector<4x8x16xf32>
    %41 = arith.addf %32, %40 : vector<4x8x16xf32>
    %42 = vector.extract_strided_slice %5 {offsets = [0, 1, 0], sizes = [4, 8, 16], strides = [1, 1, 1]} : vector<4x10x18xf32> to vector<4x8x16xf32>
    %43 = vector.broadcast %37 : vector<4x1x1xf32> to vector<4x8x16xf32>
    %44 = arith.mulf %43, %42 : vector<4x8x16xf32>
    %45 = arith.addf %36, %44 : vector<4x8x16xf32>
    %46 = vector.extract_strided_slice %7 {offsets = [0, 1, 1], sizes = [4, 1, 1], strides = [1, 1, 1]} : vector<4x3x3xf32> to vector<4x1x1xf32>
    %47 = vector.extract_strided_slice %6 {offsets = [0, 1, 1], sizes = [4, 8, 16], strides = [1, 1, 1]} : vector<4x10x18xf32> to vector<4x8x16xf32>
    %48 = vector.broadcast %46 : vector<4x1x1xf32> to vector<4x8x16xf32>
    %49 = arith.mulf %48, %47 : vector<4x8x16xf32>
    %50 = arith.addf %41, %49 : vector<4x8x16xf32>
    %51 = vector.extract_strided_slice %5 {offsets = [0, 1, 1], sizes = [4, 8, 16], strides = [1, 1, 1]} : vector<4x10x18xf32> to vector<4x8x16xf32>
    %52 = vector.broadcast %46 : vector<4x1x1xf32> to vector<4x8x16xf32>
    %53 = arith.mulf %52, %51 : vector<4x8x16xf32>
    %54 = arith.addf %45, %53 : vector<4x8x16xf32>
    %55 = vector.extract_strided_slice %7 {offsets = [0, 1, 2], sizes = [4, 1, 1], strides = [1, 1, 1]} : vector<4x3x3xf32> to vector<4x1x1xf32>
    %56 = vector.extract_strided_slice %6 {offsets = [0, 1, 2], sizes = [4, 8, 16], strides = [1, 1, 1]} : vector<4x10x18xf32> to vector<4x8x16xf32>
    %57 = vector.broadcast %55 : vector<4x1x1xf32> to vector<4x8x16xf32>
    %58 = arith.mulf %57, %56 : vector<4x8x16xf32>
    %59 = arith.addf %50, %58 : vector<4x8x16xf32>
    %60 = vector.extract_strided_slice %5 {offsets = [0, 1, 2], sizes = [4, 8, 16], strides = [1, 1, 1]} : vector<4x10x18xf32> to vector<4x8x16xf32>
    %61 = vector.broadcast %55 : vector<4x1x1xf32> to vector<4x8x16xf32>
    %62 = arith.mulf %61, %60 : vector<4x8x16xf32>
    %63 = arith.addf %54, %62 : vector<4x8x16xf32>
    %64 = vector.extract_strided_slice %7 {offsets = [0, 2, 0], sizes = [4, 1, 1], strides = [1, 1, 1]} : vector<4x3x3xf32> to vector<4x1x1xf32>
    %65 = vector.extract_strided_slice %6 {offsets = [0, 2, 0], sizes = [4, 8, 16], strides = [1, 1, 1]} : vector<4x10x18xf32> to vector<4x8x16xf32>
    %66 = vector.broadcast %64 : vector<4x1x1xf32> to vector<4x8x16xf32>
    %67 = arith.mulf %66, %65 : vector<4x8x16xf32>
    %68 = arith.addf %59, %67 : vector<4x8x16xf32>
    %69 = vector.extract_strided_slice %5 {offsets = [0, 2, 0], sizes = [4, 8, 16], strides = [1, 1, 1]} : vector<4x10x18xf32> to vector<4x8x16xf32>
    %70 = vector.broadcast %64 : vector<4x1x1xf32> to vector<4x8x16xf32>
    %71 = arith.mulf %70, %69 : vector<4x8x16xf32>
    %72 = arith.addf %63, %71 : vector<4x8x16xf32>
    %73 = vector.extract_strided_slice %7 {offsets = [0, 2, 1], sizes = [4, 1, 1], strides = [1, 1, 1]} : vector<4x3x3xf32> to vector<4x1x1xf32>
    %74 = vector.extract_strided_slice %6 {offsets = [0, 2, 1], sizes = [4, 8, 16], strides = [1, 1, 1]} : vector<4x10x18xf32> to vector<4x8x16xf32>
    %75 = vector.broadcast %73 : vector<4x1x1xf32> to vector<4x8x16xf32>
    %76 = arith.mulf %75, %74 : vector<4x8x16xf32>
    %77 = arith.addf %68, %76 : vector<4x8x16xf32>
    %78 = vector.extract_strided_slice %5 {offsets = [0, 2, 1], sizes = [4, 8, 16], strides = [1, 1, 1]} : vector<4x10x18xf32> to vector<4x8x16xf32>
    %79 = vector.broadcast %73 : vector<4x1x1xf32> to vector<4x8x16xf32>
    %80 = arith.mulf %79, %78 : vector<4x8x16xf32>
    %81 = arith.addf %72, %80 : vector<4x8x16xf32>
    %82 = vector.extract_strided_slice %7 {offsets = [0, 2, 2], sizes = [4, 1, 1], strides = [1, 1, 1]} : vector<4x3x3xf32> to vector<4x1x1xf32>
    %83 = vector.extract_strided_slice %6 {offsets = [0, 2, 2], sizes = [4, 8, 16], strides = [1, 1, 1]} : vector<4x10x18xf32> to vector<4x8x16xf32>
    %84 = vector.broadcast %82 : vector<4x1x1xf32> to vector<4x8x16xf32>
    %85 = arith.mulf %84, %83 : vector<4x8x16xf32>
    %86 = arith.addf %77, %85 : vector<4x8x16xf32>
    %87 = vector.extract_strided_slice %5 {offsets = [0, 2, 2], sizes = [4, 8, 16], strides = [1, 1, 1]} : vector<4x10x18xf32> to vector<4x8x16xf32>
    %88 = vector.broadcast %82 : vector<4x1x1xf32> to vector<4x8x16xf32>
    %89 = arith.mulf %88, %87 : vector<4x8x16xf32>
    %90 = arith.addf %81, %89 : vector<4x8x16xf32>
    %c0_11 = arith.constant 0 : index
    %c0_12 = arith.constant 0 : index
    %c0_13 = arith.constant 0 : index
    %91 = vector.load %arg4[%c0_11, %c0_12, %c0_13] : memref<4x1x1xf32, #tpu.memory_space<vmem>>, vector<4x1x1xf32>
    %92 = vector.broadcast %91 : vector<4x1x1xf32> to vector<4x8x16xf32>
    %93 = arith.addf %86, %92 : vector<4x8x16xf32>
    %94 = vector.broadcast %91 : vector<4x1x1xf32> to vector<4x8x16xf32>
    %95 = arith.addf %90, %94 : vector<4x8x16xf32>
    %cst_14 = arith.constant 9.99999993E-9 : f32
    %96 = vector.broadcast %cst_14 : f32 to vector<4x8x16xf32>
    %97 = arith.maximumf %95, %96 : vector<4x8x16xf32>
    %98 = tpu.reciprocal %97 : vector<4x8x16xf32> -> vector<4x8x16xf32>
    %99 = arith.mulf %93, %98 : vector<4x8x16xf32>
    %100 = vector.shape_cast %99 : vector<4x8x16xf32> to vector<4x128xf32>
    %101 = vector.shape_cast %95 : vector<4x8x16xf32> to vector<4x128xf32>
    %c0_15 = arith.constant 0 : index
    %c0_16 = arith.constant 0 : index
    %102 = vector.load %arg5[%c0_15, %c0_16] : memref<8x4xf32, #tpu.memory_space<vmem>>, vector<8x4xf32>
    %cst_17 = arith.constant dense<0.000000e+00> : vector<8x128xf32>
    %103 = tpu.matmul %102, %100, %cst_17 {dimension_numbers = #tpu.dot_dimension_numbers<[1], [0], [0], [1], [0, 0, 1, 1], [], []>} : vector<8x4xf32>, vector<4x128xf32>, vector<8x128xf32> -> vector<8x128xf32>
    %c0_18 = arith.constant 0 : index
    %c0_19 = arith.constant 0 : index
    %104 = vector.load %arg6[%c0_18, %c0_19] : memref<8x4xf32, #tpu.memory_space<vmem>>, vector<8x4xf32>
    %cst_20 = arith.constant dense<0.000000e+00> : vector<8x128xf32>
    %105 = tpu.matmul %104, %101, %cst_20 {dimension_numbers = #tpu.dot_dimension_numbers<[1], [0], [0], [1], [0, 0, 1, 1], [], []>} : vector<8x4xf32>, vector<4x128xf32>, vector<8x128xf32> -> vector<8x128xf32>
    %106 = arith.addf %103, %105 : vector<8x128xf32>
    %c0_21 = arith.constant 0 : index
    %c0_22 = arith.constant 0 : index
    %107 = vector.load %arg7[%c0_21, %c0_22] : memref<8x1xf32, #tpu.memory_space<vmem>>, vector<8x1xf32>
    %108 = vector.broadcast %107 : vector<8x1xf32> to vector<8x128xf32>
    %109 = arith.addf %106, %108 : vector<8x128xf32>
    %c0_23 = arith.constant 0 : index
    %c0_24 = arith.constant 0 : index
    %110 = vector.load %arg8[%c0_23, %c0_24] : memref<8x128xf32, #tpu.memory_space<vmem>>, vector<8x128xf32>
    tpu.vector_store %arg8[%c0_23, %c0_24], %109 {strides = array<i32>} : memref<8x128xf32, #tpu.memory_space<vmem>>, vector<8x128xf32>,
    return
  }
  func.func @transform_0(%arg0: i32) -> (i32, i32, i32, i32) {
    %c0_i32 = arith.constant 0 : i32
    %c0_i32_0 = arith.constant 0 : i32
    %c0_i32_1 = arith.constant 0 : i32
    %c0_i32_2 = arith.constant 0 : i32
    return %arg0, %c0_i32, %c0_i32_0, %c0_i32_1 : i32, i32, i32, i32
  }
  func.func @transform_1(%arg0: i32) -> (i32, i32, i32, i32) {
    %c0_i32 = arith.constant 0 : i32
    %c0_i32_0 = arith.constant 0 : i32
    %c0_i32_1 = arith.constant 0 : i32
    %c0_i32_2 = arith.constant 0 : i32
    return %arg0, %c0_i32, %c0_i32_0, %c0_i32_1 : i32, i32, i32, i32
  }
  func.func @transform_2(%arg0: i32) -> (i32, i32, i32) {
    %c0_i32 = arith.constant 0 : i32
    %c0_i32_0 = arith.constant 0 : i32
    %c0_i32_1 = arith.constant 0 : i32
    %c0_i32_2 = arith.constant 0 : i32
    return %c0_i32, %c0_i32_0, %c0_i32_1 : i32, i32, i32
  }
  func.func @transform_3(%arg0: i32) -> (i32, i32, i32) {
    %c0_i32 = arith.constant 0 : i32
    %c0_i32_0 = arith.constant 0 : i32
    %c0_i32_1 = arith.constant 0 : i32
    %c0_i32_2 = arith.constant 0 : i32
    return %c0_i32, %c0_i32_0, %c0_i32_1 : i32, i32, i32
  }
  func.func @transform_4(%arg0: i32) -> (i32, i32) {
    %c0_i32 = arith.constant 0 : i32
    %c0_i32_0 = arith.constant 0 : i32
    %c0_i32_1 = arith.constant 0 : i32
    return %c0_i32, %c0_i32_0 : i32, i32
  }
  func.func @transform_5(%arg0: i32) -> (i32, i32) {
    %c0_i32 = arith.constant 0 : i32
    %c0_i32_0 = arith.constant 0 : i32
    %c0_i32_1 = arith.constant 0 : i32
    return %c0_i32, %c0_i32_0 : i32, i32
  }
  func.func @transform_6(%arg0: i32) -> (i32, i32) {
    %c0_i32 = arith.constant 0 : i32
    %c0_i32_0 = arith.constant 0 : i32
    %c0_i32_1 = arith.constant 0 : i32
    return %c0_i32, %c0_i32_0 : i32, i32
  }
  func.func @transform_7(%arg0: i32) -> (i32, i32) {
    %c0_i32 = arith.constant 0 : i32
    %c0_i32_0 = arith.constant 0 : i32
    return %c0_i32, %arg0 : i32, i32
  }
}

</mosaic_0001>

<bundles_post_ra>
// kernel: grid_convcnp_encoder.1
= control target key start
LH: loop header
LB: loop body
LE: loop exit
PB: predicated region body
PF: predicated region fallthrough
CT: control target
= control target key end

     0   :  { %s1701_s24 = smov 0   ;;  %s2594_s0 = inlined_call_operand.vmem [shape: f32[2,4,10,18], index: 0, kind: input, shape index: {}]   ;;  %s2595_s1 = inlined_call_operand.vmem [shape: f32[2,1,10,18], index: 1, kind: input, shape index: {}]   ;;  %s2596_s2 = inlined_call_operand.vmem [shape: f32[4,3,3], index: 2, kind: input, shape index: {}]   ;;  %s2597_s3 = inlined_call_operand.vmem [shape: f32[4,1,1], index: 3, kind: input, shape index: {}]   ;;  %s2598_s4 = inlined_call_operand.vmem [shape: f32[8,4], index: 4, kind: input, shape index: {}]   ;;  %s2599_s5 = inlined_call_operand.vmem [shape: f32[8,4], index: 5, kind: input, shape index: {}]   ;;  %s2600_s6 = inlined_call_operand.vmem [shape: f32[8,1], index: 6, kind: input, shape index: {}]   ;;  %s2601_s7 = inlined_call_operand.vmem [shape: f32[8,256], index: 7, kind: output, shape index: {}]  }
   0x1 LB: > { %s1516_s25 = sadd.s32 4294967295, %s1647_s24   ;;  %p1520_p0 = scmp.ge.s32.totalorder %s1647_s24, 1  ;;  %s1647_s24 = sphi %s1701_s24, %s17_s24  }
   0x2   : > { %p247_p1 = scmp.lt.s32.totalorder %s1647_s24, 3 }
   0x4   : > { %p248_p2 = pnand %p1520_p0, %p247_p1 }
   0x6   : > { %251 = sbr.rel (%p248_p2) target bundleno = 720 (0x2d0), region = 48 }
   0xb   : > { %v317_v0 = vld [vmem:[%s2596_s2 + $0x8] sm:$0x7]  ;;  %v315_v1 = vld [vmem:[%s2596_s2] sm:$0x7]  ;;  %s1649_s30 = smov 127   ;;  %s1650_s10 = smov 126  }
   0xc   : > { %355 = vrot.lane.b32.xlu1 %v317_v0, %s1649_s30  ;;  %351 = vrot.lane.b32.xlu0 %v315_v1, %s1649_s30  ;;  %v316_v2 = vld [vmem:[%s2596_s2 + $0x4] sm:$0x7]  ;;  %1534 = vpush %v315_v1  ;;  %v318_v3 = vld [vmem:[%s2596_s2 + $0xc] sm:$0x7]  ;;  %v487_v4 = vrot.slane %v315_v1, 1  ;;  %v489_v5 = vrot.slane %v317_v0, 1 }
   0xd   : > { %419 = vrot.lane.b32.xlu2 %v315_v1, %s1650_s10  ;;  %1536 = vpush %v316_v2  ;;  %v488_v6 = vrot.slane %v316_v2, 1  ;;  %v490_v7 = vrot.slane %v318_v3, 1  ;;  %v792_v8 = vrot.slane %v315_v1, 2  ;;  %v793_v9 = vrot.slane %v316_v2, 2  ;;  %v1629_v17 = vld [vmem:[%s2597_s3 + $0x1] ss:$0 sm:$0xff] }
   0xe   : > { %1538 = vpush %v317_v0  ;;  %v795_v10 = vrot.slane %v318_v3, 2  ;;  %v794_v11 = vrot.slane %v317_v0, 2  ;;  %v1651_v13 = vmov 0   ;;  %v1630_v18 = vld [vmem:[%s2597_s3 + $0x3] ss:$0 sm:$0xff]  ;;  %p283_p3 = scmp.lt.s32.totalorder %s1516_s25, 1 }
   0xf   : > { %1540 = vpush %v318_v3  ;;  %1627 = vset.pattern.permute.xlu1 %v1651_v13  ;;  %1626 = vset.pattern.permute.xlu2 %v1651_v13  ;;  %v1631_v25 = vld [vmem:[%s2597_s3] ss:$0 sm:$0xff]  ;;  %v1632_v26 = vld [vmem:[%s2597_s3 + $0x2] ss:$0 sm:$0xff]  ;;  %vm519_vm0 = vcmask 1046528   ;;  %vm824_vm1 = vcmask 1045504  }
  0x10   : > { %1628 = vset.pattern.permute.xlu0 %v1651_v13  ;;  %s2695_s25 = smov (!%p283_p3, %s1516_s25), 1  ;;  %vm1198_vm2 = vcmask 1047556  }
  0x11   : > { %s1533_s23 = sshll.u32 %s2695_s25, 4  ;;  %s1532_s13 = sshll.u32 %s2695_s25, 6 }
  0x12   : > { %s292_s8 = scalar_lea.vmem %s2595_s1, %s1533_s23  ;;  %s1804_s19 = scalar_lea.vmem %s2594_s0, %s1532_s13 }
  0x13   : > { %v1779_v41 = vld [vmem:[%s292_s8] sm:$0xff]  ;;  %v298_v49 = vld [vmem:[%s1804_s19 + $0x8] sm:$0x3]  ;;  %v300_v53 = vld [vmem:[%s1804_s19 + $0x18] sm:$0x3] }
  0x14   : > { %357 = vrot.lane.b32.xlu1 %v318_v3, %s1649_s30  ;;  %353 = vrot.lane.b32.xlu0 %v316_v2, %s1649_s30  ;;  %v1810_v50 = vld [vmem:[%s292_s8 + $0x8] sm:$0x3]  ;;  %v299_v61 = vld [vmem:[%s1804_s19 + $0x10] sm:$0xff] }
  0x15   : > { %421 = vrot.lane.b32.xlu2 %v316_v2, %s1650_s10  ;;  %v1816_v52 = vmul.f32 %v1810_v50, %v298_v49  ;;  %v302_v55 = vld [vmem:[%s1804_s19 + $0x28] sm:$0x3]  ;;  %v1831_v60 = vmul.f32 %v1810_v50, %v300_v53 }
  0x17   : > { %2638 = vst [vmem:[#allocation2_spill] sm:$0xff] %v1816_v52 }
  0x1c   : > { %425 = vrot.lane.b32.xlu1 %v318_v3, %s1650_s10  ;;  %423 = vrot.lane.b32.xlu0 %v317_v0, %s1650_s10  ;;  %v1844_v0 = vmul.f32 %v1810_v50, %v302_v55  ;;  %v304_v3 = vld [vmem:[%s1804_s19 + $0x38] sm:$0x3] }
  0x1d   : > { %576 = vrot.lane.b32.xlu2 %v487_v4, %s1649_s30 }
  0x1e   : > { %2639 = vst [vmem:[#allocation3_spill] sm:$0xff] %v1844_v0 }
  0x24   : > { %580 = vrot.lane.b32.xlu1 %v489_v5, %s1649_s30  ;;  %578 = vrot.lane.b32.xlu0 %v488_v6, %s1649_s30 }
  0x25   : > { %582 = vrot.lane.b32.xlu2 %v490_v7, %s1649_s30 }
  0x2c   : > { %686 = vrot.lane.b32.xlu1 %v488_v6, %s1650_s10  ;;  %684 = vrot.lane.b32.xlu0 %v487_v4, %s1650_s10 }
  0x2d   : > { %688 = vrot.lane.b32.xlu2 %v489_v5, %s1650_s10 }
  0x34   : > { %881 = vrot.lane.b32.xlu1 %v792_v8, %s1649_s30  ;;  %690 = vrot.lane.b32.xlu0 %v490_v7, %s1650_s10 }
  0x35   : > { %883 = vrot.lane.b32.xlu2 %v793_v9, %s1649_s30 }
  0x3c   : > { %887 = vrot.lane.b32.xlu1 %v795_v10, %s1649_s30  ;;  %885 = vrot.lane.b32.xlu0 %v794_v11, %s1649_s30 }
  0x3d   : > { %989 = vrot.lane.b32.xlu2 %v792_v8, %s1650_s10  ;;  %s1763_s21 = spop %1534 }
  0x3e   : > { %s1765_s22 = spop %1536 }
  0x3f   : > { %s1768_s26 = spop %1538 }
  0x40   : > { %s1770_s27 = spop %1540 }
  0x44   : > { %993 = vrot.lane.b32.xlu1 %v794_v11, %s1650_s10  ;;  %991 = vrot.lane.b32.xlu0 %v793_v9, %s1650_s10 }
  0x45   : > { %995 = vrot.lane.b32.xlu2 %v795_v10, %s1650_s10 }
  0x4c   : > { %1114 = vperm.xlu1 %1627, %v1629_v17  }
  0x4d   : > { %1122 = vperm.xlu2 %1626, %v1630_v18  }
  0x54   : > { %1110 = vperm.xlu1 %1627, %v1631_v25  }
  0x55   : > { %1118 = vperm.xlu2 %1626, %v1632_v26  }
  0x67   : > { %v420_v12 = vpop.permute.xlu2 %419 }
  0x6f   : > { %v422_v14 = vpop.permute.xlu2 %421 }
  0x77   : > { %v577_v19 = vpop.permute.xlu2 %576 }
  0x7e   : > { %v356_v15 = vpop.permute.xlu1 %355  ;;  %v352_v16 = vpop.permute.xlu0 %351 }
  0x7f   : > { %1542 = vpush %v352_v16  ;;  %v583_v22 = vpop.permute.xlu2 %582 }
  0x86   : > { %v358_v20 = vpop.permute.xlu1 %357  ;;  %v354_v21 = vpop.permute.xlu0 %353 }
  0x87   : > { %1544 = vpush %v354_v21  ;;  %v689_v29 = vpop.permute.xlu2 %688 }
  0x88   : > { %1546 = vpush %v356_v15  ;;  %v297_v15 = vld [vmem:[%s1804_s19] sm:$0xff] }
  0x89   : > { %1548 = vpush %v358_v20  ;;  %v1900_v20 = vmul.f32 %v1779_v41, %v297_v15 }
  0x8a   : > { %1550 = vpush %v420_v12 }
  0x8b   : > { %1552 = vpush %v422_v14 }
  0x8c   : > { %2641 = vst [vmem:[#allocation5_spill] sm:$0xff] %v1900_v20 }
  0x8e   : > { %v426_v23 = vpop.permute.xlu1 %425  ;;  %v424_v24 = vpop.permute.xlu0 %423 }
  0x8f   : > { %1554 = vpush %v424_v24  ;;  %v884_v32 = vpop.permute.xlu2 %883  ;;  %v301_v24 = vld [vmem:[%s1804_s19 + $0x20] sm:$0xff] }
  0x90   : > { %1556 = vpush %v426_v23 }
  0x91   : > { %1558 = vpush %v487_v4  ;;  %v1854_v4 = vmul.f32 %v1779_v41, %v299_v61 }
  0x92   : > { %1560 = vpush %v488_v6 }
  0x93   : > { %1562 = vpush %v489_v5 }
  0x94   : > { %1564 = vpush %v490_v7 }
  0x95   : > { %1566 = vpush %v577_v19  ;;  %v303_v19 = vld [vmem:[%s1804_s19 + $0x30] sm:$0xff] }
  0x96   : > { %v581_v27 = vpop.permute.xlu1 %580  ;;  %v579_v28 = vpop.permute.xlu0 %578  ;;  %v1903_v21 = vmul.f32 %v1779_v41, %v303_v19 }
  0x97   : > { %1568 = vpush %v579_v28  ;;  %v990_v35 = vpop.permute.xlu2 %989  ;;  %v1921_v28 = vmul.f32 %v1779_v41, %v301_v24 }
  0x98   : > { %1570 = vpush %v581_v27 }
  0x99   : > { %1572 = vpush %v583_v22 }
  0x9a   : > { %2642 = vst [vmem:[#allocation6_spill] sm:$0xff] %v1903_v21 }
  0x9b   : > { %2644 = vst [vmem:[#allocation8_spill] sm:$0xff] %v1921_v28 }
  0x9e   : > { %v687_v30 = vpop.permute.xlu1 %686  ;;  %v685_v31 = vpop.permute.xlu0 %684 }
  0x9f   : > { %1574 = vpush %v685_v31  ;;  %v996_v38 = vpop.permute.xlu2 %995 }
  0xa0   : > { %1576 = vpush %v687_v30 }
  0xa1   : > { %1578 = vpush %v689_v29 }
  0xa6   : > { %v882_v33 = vpop.permute.xlu1 %881  ;;  %v691_v34 = vpop.permute.xlu0 %690 }
  0xa7   : > { %1580 = vpush %v691_v34 }
  0xa8   : > { %1582 = vpush %v792_v8 }
  0xa9   : > { %1584 = vpush %v793_v9 }
  0xaa   : > { %1586 = vpush %v794_v11 }
  0xab   : > { %1588 = vpush %v795_v10  ;;  %v1874_v10 = vmul.f32 %v1810_v50, %v304_v3 }
  0xac   : > { %1590 = vpush %v882_v33 }
  0xad   : > { %1592 = vpush %v884_v32 }
  0xae   : > { %v888_v36 = vpop.permute.xlu1 %887  ;;  %v886_v37 = vpop.permute.xlu0 %885  ;;  %2640 = vst [vmem:[#allocation4_spill] sm:$0xff] %v1874_v10 }
  0xaf   : > { %1594 = vpush %v886_v37 }
  0xb0   : > { %1596 = vpush %v888_v36  ;;  %s1775_s9 = spop %1542 }
  0xb1   : > { %1598 = vpush %v990_v35  ;;  %v360_v51 = vstv %s1775_s9 }
  0xb2   : > { %v395_v56 = vmul.f32 %v360_v51, %v1779_v41  ;;  %v371_v23 = vmul.f32 %v360_v51, %v1900_v20 }
  0xb6   : > { %v994_v39 = vpop.permute.xlu1 %993  ;;  %v992_v40 = vpop.permute.xlu0 %991 }
  0xb7   : > { %1600 = vpush %v992_v40 }
  0xb8   : > { %s1777_s11 = spop %1544  ;;  %1602 = vpush %v994_v39 }
  0xb9   : > { %v363_v42 = vstv %s1777_s11  ;;  %s1782_s12 = spop %1546  ;;  %1604 = vpush %v996_v38 }
  0xba   : > { %v396_v43 = vmul.f32 %v363_v42, %v1779_v41  ;;  %v366_v44 = vstv %s1782_s12  ;;  %s1787_s14 = spop %1548  ;;  %v372_v13 = vmul.f32 %v363_v42, %v1854_v4 }
  0xbb   : > { %v397_v45 = vmul.f32 %v366_v44, %v1779_v41  ;;  %v369_v46 = vstv %s1787_s14  ;;  %s1793_s15 = spop %1550  ;;  %v373_v34 = vmul.f32 %v366_v44, %v1921_v28 }
  0xbc   : > { %v398_v47 = vmul.f32 %v369_v46, %v1779_v41  ;;  %405 = vrot.lane.b32.xlu1 %v396_v43, %s1649_s30  ;;  %s1799_s16 = spop %1552  ;;  %v428_v5 = vstv %s1793_s15  ;;  %v374_v25 = vmul.f32 %v369_v46, %v1903_v21 }
  0xbd   : > { %407 = vrot.lane.b32.xlu2 %v397_v45, %s1649_s30  ;;  %v431_v48 = vstv %s1799_s16  ;;  %v463_v12 = vmul.f32 %v428_v5, %v1779_v41  ;;  %v439_v35 = vmul.f32 %v428_v5, %v1900_v20 }
  0xbe   : > { %409 = vrot.lane.b32.xlu0 %v398_v47, %s1649_s30  ;;  %v464_v54 = vmul.f32 %v431_v48, %v1779_v41  ;;  %v440_v3 = vmul.f32 %v431_v48, %v1854_v4 }
  0xc0   : > { %s1813_s20 = spop %1554 }
  0xc1   : > { %s1822_s23 = spop %1556  ;;  %v434_v11 = vstv %s1813_s20 }
  0xc2   : > { %v437_v57 = vstv %s1822_s23  ;;  %s1559_s28 = spop %1558  ;;  %v465_v16 = vmul.f32 %v434_v11, %v1779_v41  ;;  %v441_v33 = vmul.f32 %v434_v11, %v1921_v28 }
  0xc3   : > { %v466_v58 = vmul.f32 %v437_v57, %v1779_v41  ;;  %v1828_v59 = vstv %s1559_s28  ;;  %s1561_s29 = spop %1560  ;;  %v442_v22 = vmul.f32 %v437_v57, %v1903_v21 }
  0xc4   : > { %403 = vrot.lane.b32.xlu1 %v395_v56, %s1649_s30  ;;  %v1837_v62 = vmul.f32 %v1828_v59, %v1816_v52  ;;  %v1841_v63 = vmul.f32 %v1828_v59, %v1810_v50  ;;  %s1563_s8 = spop %1562  ;;  %v1847_v1 = vstv %s1561_s29  ;;  %v1945_v42 = vmul.f32 %v1828_v59, %v1900_v20 }
  0xc5   : > { %473 = vrot.lane.b32.xlu2 %v464_v54, %s1650_s10  ;;  %v1849_v2 = vstv %s1563_s8  ;;  %v1859_v6 = vmul.f32 %v1847_v1, %v1831_v60  ;;  %v1863_v7 = vmul.f32 %v1847_v1, %v1810_v50  ;;  %s1565_s9 = spop %1564  ;;  %v1949_v43 = vmul.f32 %v1828_v59, %v1779_v41 }
  0xc6   : > { %477 = vrot.lane.b32.xlu0 %v466_v58, %s1650_s10  ;;  %v1867_v8 = vmul.f32 %v1849_v2, %v1844_v0  ;;  %v1871_v9 = vmul.f32 %v1849_v2, %v1810_v50  ;;  %v1879_v14 = vstv %s1565_s9  ;;  %s1892_s11 = spop %1566 }
  0xc7   : > { %v1886_v17 = vmul.f32 %v1879_v14, %v1874_v10  ;;  %v1890_v18 = vmul.f32 %v1879_v14, %v1810_v50 }
  0xc8   : > { %s1897_s13 = spop %1568 }
  0xc9   : > { %s1571_s15 = spop %1570  ;;  %v1952_v44 = vstv %s1897_s13 }
  0xca   : > { %s1573_s17 = spop %1572  ;;  %v1913_v26 = vstv %s1571_s15  ;;  %v642_v11 = vmul.f32 %v1952_v44, %v1779_v41 }
  0xcb   : > { %v1915_v27 = vstv %s1573_s17  ;;  %v644_v29 = vmul.f32 %v1913_v26, %v1779_v41  ;;  %v645_v30 = vmul.f32 %v1913_v26, %v1810_v50  ;;  %v2122_v5 = vmul.f32 %v1913_v26, %v1844_v0 }
  0xcc   : > { %471 = vrot.lane.b32.xlu1 %v463_v12, %s1650_s10  ;;  %2643 = vst [vmem:[#allocation7_spill] sm:$0xff] %v1915_v27  ;;  %v646_v31 = vmul.f32 %v1915_v27, %v1779_v41  ;;  %v647_v32 = vmul.f32 %v1915_v27, %v1810_v50  ;;  %v643_v12 = vmul.f32 %v1952_v44, %v1810_v50 }
  0xcd   : > { %381 = vrot.lane.b32.xlu2 %v372_v13, %s1649_s30  ;;  %v662_v36 = vrot.slane %v644_v29, 1  ;;  %v663_v37 = vrot.slane %v645_v30, 1 }
  0xce   : > { %475 = vrot.lane.b32.xlu0 %v465_v16, %s1650_s10  ;;  %v665_v38 = vrot.slane %v646_v31, 1  ;;  %v666_v39 = vrot.slane %v647_v32, 1  ;;  %v1996_v16 = vmul.f32 %v1847_v1, %v1854_v4 }
  0xcf   : > { %v664_v46 = vsel %vm519_vm0, %v662_v36, %v663_v37  ;;  %v2029_v36 = vstv %s1892_s11 }
  0xd0   : > { %s1917_s18 = spop %1574  ;;  %v667_v47 = vsel %vm519_vm0, %v665_v38, %v666_v39  ;;  %2647 = vst [vmem:[#allocation11_spill] sm:$0xff] %v2029_v36 }
  0xd1   : > { %s1577_s19 = spop %1576 }
  0xd2   : > { %s1931_s14 = spop %1578  ;;  %v1941_v40 = vstv %s1577_s19  ;;  %s1660_s19 = smov 112  }
  0xd3   : > { %2645 = vst [vmem:[#allocation9_spill] sm:$0xff] %v1941_v40  ;;  %v750_v53 = vmul.f32 %v1941_v40, %v1779_v41  ;;  %v751_v54 = vmul.f32 %v1941_v40, %v1810_v50 }
  0xd4   : > { %453 = vrot.lane.b32.xlu1 %v442_v22, %s1650_s10 }
  0xd5   : > { %379 = vrot.lane.b32.xlu2 %v371_v23, %s1649_s30  ;;  %v767_v19 = vrot.slane %v750_v53, 1  ;;  %v768_v22 = vrot.slane %v751_v54, 1 }
  0xd6   : > { %385 = vrot.lane.b32.xlu0 %v374_v25, %s1649_s30  ;;  %v2016_v25 = vmul.f32 %v1847_v1, %v1779_v41  ;;  %v2032_v1 = vstv %s1931_s14 }
  0xd7   : > { %2648 = vst [vmem:[#allocation12_spill] sm:$0xff] %v2032_v1  ;;  %v769_v53 = vsel %vm519_vm0, %v767_v19, %v768_v22 }
  0xd8   : > { %s1581_s20 = spop %1580 }
  0xd9   : > { %s1583_s23 = spop %1582  ;;  %v1954_v45 = vstv %s1581_s20 }
  0xda   : > { %s1585_s12 = spop %1584  ;;  %2646 = vst [vmem:[#allocation10_spill] sm:$0xff] %v1954_v45  ;;  %v1958_v49 = vstv %s1583_s23  ;;  %v754_v57 = vmul.f32 %v1954_v45, %v1779_v41  ;;  %v755_v58 = vmul.f32 %v1954_v45, %v1810_v50 }
  0xdb   : > { %v1960_v51 = vstv %s1585_s12  ;;  %s1587_s28 = spop %1586  ;;  %v1968_v55 = vmul.f32 %v1958_v49, %v1816_v52  ;;  %v1972_v56 = vmul.f32 %v1958_v49, %v1810_v50 }
  0xdc   : > { %451 = vrot.lane.b32.xlu1 %v441_v33, %s1650_s10  ;;  %v1980_v59 = vmul.f32 %v1960_v51, %v1831_v60  ;;  %v1982_v61 = vstv %s1587_s28  ;;  %s1589_s29 = spop %1588  ;;  %v2001_v48 = vmul.f32 %v1960_v51, %v1810_v50  ;;  %v773_v29 = vrot.slane %v754_v57, 1 }
  0xdd   : > { %447 = vrot.lane.b32.xlu2 %v439_v35, %s1650_s10  ;;  %s2003_s16 = spop %1590  ;;  %v2008_v23 = vmul.f32 %v1982_v61, %v1844_v0  ;;  %v2012_v24 = vmul.f32 %v1982_v61, %v1810_v50  ;;  %v774_v30 = vrot.slane %v755_v58, 1  ;;  %v2019_v31 = vstv %s1589_s29 }
  0xde   : > { %383 = vrot.lane.b32.xlu0 %v373_v34, %s1649_s30  ;;  %s2021_s8 = spop %1592  ;;  %v2026_v33 = vmul.f32 %v1849_v2, %v1921_v28  ;;  %v659_v34 = vrot.slane %v642_v11, 1  ;;  %v660_v35 = vrot.slane %v643_v12, 1  ;;  %v2036_v37 = vmul.f32 %v2019_v31, %v1874_v10 }
  0xdf   : > { %v2040_v38 = vmul.f32 %v2019_v31, %v1810_v50  ;;  %v2054_v57 = vmul.f32 %v1879_v14, %v1903_v21  ;;  %v2058_v58 = vmul.f32 %v1879_v14, %v1779_v41  ;;  %v640_v11 = vmul.f32 %v2029_v36, %v1779_v41 }
  0xe0   : > { %s2042_s9 = spop %1594  ;;  %v753_v12 = vmul.f32 %v2032_v1, %v1810_v50  ;;  %v661_v19 = vsel %vm519_vm0, %v659_v34, %v660_v35  ;;  %v641_v14 = vmul.f32 %v2029_v36, %v1810_v50  ;;  %v2095_v35 = vmul.f32 %v1913_v26, %v1921_v28 }
  0xe1   : > { %s1597_s11 = spop %1596  ;;  %v2118_v22 = vmul.f32 %v1960_v51, %v1854_v4 }
  0xe2   : > { %v2080_v34 = vstv %s1597_s11  ;;  %s2087_s13 = spop %1598  ;;  %v771_v32 = vrot.slane %v753_v12, 1  ;;  %v657_v54 = vrot.slane %v641_v14, 1  ;;  %v2110_v12 = vstv %s2021_s8 }
  0xe3   : > { %2650 = vst [vmem:[#allocation14_spill] sm:$0xff] %v2080_v34  ;;  %v2114_v14 = vmul.f32 %v1958_v49, %v1779_v41  ;;  %v947_v45 = vmul.f32 %v2110_v12, %v1779_v41 }
  0xe4   : > { %672 = vrot.lane.b32.xlu1 %v664_v46, %s1649_s30  ;;  %v951_v46 = vmul.f32 %v2080_v34, %v1779_v41  ;;  %2651 = vst [vmem:[#allocation15_spill] sm:$0xff] %v2110_v12 }
  0xe5   : > { %674 = vrot.lane.b32.xlu2 %v667_v47, %s1649_s30  ;;  %v2048_v47 = vmul.f32 %v1849_v2, %v1779_v41  ;;  %v752_v2 = vmul.f32 %v2032_v1, %v1779_v41  ;;  %v2127_v1 = vmul.f32 %v1960_v51, %v1779_v41 }
  0xe6   : > { %449 = vrot.lane.b32.xlu0 %v440_v3, %s1650_s10  ;;  %v775_v3 = vsel %vm519_vm0, %v773_v29, %v774_v30  ;;  %v2073_v29 = vstv %s1917_s18  ;;  %v970_v13 = vrot.slane %v951_v46, 2  ;;  %v948_v46 = vmul.f32 %v2110_v12, %v1810_v50 }
  0xe7   : > { %2649 = vst [vmem:[#allocation13_spill] sm:$0xff] %v2073_v29  ;;  %v2091_v30 = vmul.f32 %v2073_v29, %v1779_v41  ;;  %v862_v12 = vrot.slane %v1972_v56, 2 }
  0xe8   : > { %s2101_s15 = spop %1600  ;;  %v965_v56 = vrot.slane %v948_v46, 2 }
  0xe9   : > { %s1603_s17 = spop %1602  ;;  %v764_v15 = vrot.slane %v2091_v30, 1  ;;  %v849_v30 = vmul.f32 %v1982_v61, %v1779_v41  ;;  %v2182_v10 = vstv %s2101_s15 }
  0xea   : > { %s1605_s18 = spop %1604 }
  0xec   : > { %778 = vrot.lane.b32.xlu1 %v769_v53, %s1650_s10  ;;  %v656_v53 = vrot.slane %v640_v11, 1  ;;  %v749_v11 = vmul.f32 %v2073_v29, %v1810_v50 }
  0xed   : > { %782 = vrot.lane.b32.xlu2 %v775_v3, %s1650_s10  ;;  %v770_v3 = vrot.slane %v752_v2, 1  ;;  %v2107_v2 = vmul.f32 %v1958_v49, %v1900_v20 }
  0xee   : > { %670 = vrot.lane.b32.xlu0 %v661_v19, %s1649_s30  ;;  %v952_v19 = vmul.f32 %v2080_v34, %v1810_v50  ;;  %v765_v0 = vrot.slane %v749_v11, 1  ;;  %v2151_v11 = vstv %s2003_s16  ;;  %s1525_s16 = sshll.u32 %s2695_s25, 3 }
  0xef   : > { %v772_v49 = vsel %vm519_vm0, %v770_v3, %v771_v32  ;;  %v658_v32 = vsel %vm519_vm0, %v656_v53, %v657_v54  ;;  %v861_v3 = vrot.slane %v2114_v14, 2  ;;  %2654 = vst [vmem:[#allocation18_spill] sm:$0xff] %v2151_v11  ;;  %v2155_v54 = vstv %s1605_s18  ;;  %s296_s11 = scalar_lea.vmem %s2601_s7, %s1525_s16 }
  0xf0   : > { %v971_v39 = vrot.slane %v952_v19, 2  ;;  %v2135_v19 = vstv %s2042_s9  ;;  %2655 = vst [vmem:[#allocation19_spill] sm:$0xff] %v2155_v54  ;;  %v864_v53 = vrot.slane %v2127_v1, 2  ;;  %v964_v14 = vrot.slane %v947_v45, 2 }
  0xf1   : > { %2652 = vst [vmem:[#allocation16_spill] sm:$0xff] %v2135_v19  ;;  %v851_v45 = vmul.f32 %v2019_v31, %v1779_v41  ;;  %v945_v1 = vmul.f32 %v2151_v11, %v1779_v41  ;;  %v946_v46 = vmul.f32 %v2151_v11, %v1810_v50  ;;  %v766_v40 = vsel %vm519_vm0, %v764_v15, %v765_v0 }
  0xf2   : > { %v972_v26 = vsel %vm824_vm1, %v970_v13, %v971_v39  ;;  %v2147_v13 = vstv %s1603_s17  ;;  %v1059_v39 = vmul.f32 %v2155_v54, %v1779_v41  ;;  %v966_v52 = vsel %vm824_vm1, %v964_v14, %v965_v56 }
  0xf3   : > { %2653 = vst [vmem:[#allocation17_spill] sm:$0xff] %v2147_v13  ;;  %v1057_v51 = vmul.f32 %v2147_v13, %v1779_v41  ;;  %v1058_v29 = vmul.f32 %v2147_v13, %v1810_v50  ;;  %v1060_v13 = vmul.f32 %v2155_v54, %v1810_v50  ;;  %v867_v54 = vrot.slane %v849_v30, 2 }
  0xf4   : > { %979 = vrot.lane.b32.xlu1 %v972_v26, %s1649_s30  ;;  %v949_v26 = vmul.f32 %v2135_v19, %v1779_v41  ;;  %v1078_v34 = vrot.slane %v1059_v39, 2  ;;  %v868_v39 = vrot.slane %v2012_v24, 2  ;;  %v835_v0 = vrot.slane %v2036_v37, 2 }
  0xf5   : > { %780 = vrot.lane.b32.xlu2 %v772_v49, %s1650_s10  ;;  %v950_v49 = vmul.f32 %v2135_v19, %v1810_v50  ;;  %v814_v19 = vmul.f32 %v2019_v31, %v1903_v21  ;;  %v1075_v36 = vrot.slane %v1057_v51, 2  ;;  %v1076_v11 = vrot.slane %v1058_v29, 2 }
  0xf6   : > { %668 = vrot.lane.b32.xlu0 %v658_v32, %s1649_s30  ;;  %v812_v32 = vmul.f32 %v1982_v61, %v1921_v28  ;;  %v865_v61 = vrot.slane %v2001_v48, 2  ;;  %v967_v28 = vrot.slane %v949_v26, 2  ;;  %v1079_v20 = vrot.slane %v1060_v13, 2 }
  0xf7   : > { %v968_v27 = vrot.slane %v950_v49, 2  ;;  %v870_v48 = vrot.slane %v851_v45, 2  ;;  %v871_v31 = vrot.slane %v2040_v38, 2  ;;  %v961_v26 = vrot.slane %v945_v1, 2 }
  0xf8   : > { %v962_v21 = vrot.slane %v946_v46, 2  ;;  %v831_v49 = vrot.slane %v812_v32, 2  ;;  %v1080_v14 = vsel %vm824_vm1, %v1078_v34, %v1079_v20  ;;  %v832_v29 = vrot.slane %v2008_v23, 2 }
  0xf9   : > { %v834_v51 = vrot.slane %v814_v19, 2  ;;  %v1056_v15 = vmul.f32 %v2182_v10, %v1810_v50  ;;  %v969_v38 = vsel %vm824_vm1, %v967_v28, %v968_v27  ;;  %v2656_v24 = vrot.slane %v1890_v18, 1 }
  0xfa   : > { %v2657_v20 = vrot.slane %v2058_v58, 1  ;;  %v963_v37 = vsel %vm824_vm1, %v961_v26, %v962_v21  ;;  %v2658_v34 = vrot.slane %v1871_v9, 1  ;;  %v2659_v19 = vrot.slane %v2048_v47, 1  ;;  %v2225_v58 = vpop.permute.xlu2 %1122 }
  0xfb   : > { %v2661_v27 = vrot.slane %v2016_v25, 1  ;;  %v2223_v28 = vsel %vm824_vm1, %v870_v48, %v871_v31  ;;  %v2662_v21 = vrot.slane %v1841_v63, 1  ;;  %v2663_v9 = vrot.slane %v1949_v43, 1 }
  0xfc   : > { %1087 = vrot.lane.b32.xlu1 %v1080_v14, %s1650_s10  ;;  %v2205_v23 = vsel %vm519_vm0, %v2657_v20, %v2656_v24  ;;  %v2213_v30 = vsel %vm519_vm0, %v2659_v19, %v2658_v34  ;;  %v2664_v13 = vrot.slane %v1867_v8, 1  ;;  %v2245_v56 = vsel %vm824_vm1, %v867_v54, %v868_v39  ;;  %v2676_v14 = vld [vmem:[#allocation9_spill] sm:$0xff] }
  0xfd   : > { %975 = vrot.lane.b32.xlu2 %v966_v52, %s1649_s30  ;;  %v1055_v52 = vmul.f32 %v2182_v10, %v1779_v41  ;;  %v2232_v47 = vsel %vm519_vm0, %v2663_v9, %v2662_v21  ;;  %v2666_v63 = vrot.slane %v1859_v6, 1  ;;  %v2667_v43 = vrot.slane %v1996_v16, 1  ;;  %v2680_v21 = vld [vmem:[#allocation6_spill] sm:$0xff] }
  0xfe   : > { %776 = vrot.lane.b32.xlu0 %v766_v40, %s1650_s10  ;;  %v1077_v40 = vsel %vm824_vm1, %v1075_v36, %v1076_v11  ;;  %v2660_v36 = vrot.slane %v1863_v7, 1  ;;  %v2665_v7 = vrot.slane %v2026_v33, 1  ;;  %v2242_v11 = vsel %vm824_vm1, %v861_v3, %v862_v12  ;;  %v2681_v9 = vld [vmem:[#allocation14_spill] sm:$0xff] }
  0xff   : > { %v2252_v32 = vsel %vm519_vm0, %v2667_v43, %v2666_v63  ;;  %v2255_v8 = vsel %vm824_vm1, %v864_v53, %v865_v61  ;;  %v2668_v33 = vrot.slane %v1837_v62, 1  ;;  %v2669_v45 = vrot.slane %v1945_v42, 1 }
 0x100   : > { %v2220_v18 = vsel %vm519_vm0, %v2661_v27, %v2660_v36  ;;  %v2239_v25 = vsel %vm519_vm0, %v2665_v7, %v2664_v13  ;;  %v2670_v3 = vrot.slane %v1886_v17, 1  ;;  %v2671_v6 = vrot.slane %v2054_v57, 1  ;;  %v2682_v7 = vld [vmem:[#allocation4_spill] sm:$0xff] }
 0x101   : > { %v2262_v12 = vsel %vm519_vm0, %v2669_v45, %v2668_v33  ;;  %v2273_v54 = vsel %vm824_vm1, %v834_v51, %v835_v0  ;;  %v2276_v62 = vsel %vm824_vm1, %v831_v49, %v832_v29  ;;  %v2672_v42 = vrot.slane %v1980_v59, 2  ;;  %v2683_v33 = vld [vmem:[#allocation7_spill] sm:$0xff] }
 0x102   : > { %v2269_v16 = vsel %vm519_vm0, %v2671_v6, %v2670_v3  ;;  %v2673_v53 = vrot.slane %v2118_v22, 2  ;;  %v2674_v17 = vrot.slane %v1968_v55, 2  ;;  %v2675_v57 = vrot.slane %v2107_v2, 2  ;;  %v2314_v0 = vpop.permute.xlu2 %1118 }
 0x103   : > { %v598_v61 = vmul.f32 %v1952_v44, %v1854_v4  ;;  %v599_v59 = vmul.f32 %v1952_v44, %v1831_v60  ;;  %v1072_v48 = vrot.slane %v1055_v52, 2  ;;  %v1073_v22 = vrot.slane %v1056_v15, 2  ;;  %v2677_v52 = vld [vmem:[#allocation5_spill] sm:$0xff]  ;;  %v2678_v15 = vld [vmem:[#allocation11_spill] sm:$0xff] }
 0x104   : > { %v2283_v1 = vsel %vm824_vm1, %v2673_v53, %v2672_v42  ;;  %v2290_v46 = vsel %vm824_vm1, %v2675_v57, %v2674_v17  ;;  %v618_v31 = vrot.slane %v2095_v35, 1  ;;  %v619_v26 = vrot.slane %v2122_v5, 1  ;;  %1085 = vrot.lane.b32.xlu1 %v1077_v40, %s1650_s10  ;;  %v2684_v42 = vld [vmem:[#allocation13_spill] sm:$0xff] }
 0x105   : > { %973 = vrot.lane.b32.xlu2 %v963_v37, %s1649_s30  ;;  %v2301_v55 = vstv %s2087_s13  ;;  %v615_v2 = vrot.slane %v598_v61, 1  ;;  %v616_v49 = vrot.slane %v599_v59, 1  ;;  %v1074_v39 = vsel %vm824_vm1, %v1072_v48, %v1073_v22 }
 0x106   : > { %977 = vrot.lane.b32.xlu0 %v969_v38, %s1649_s30  ;;  %v706_v29 = vmul.f32 %v2676_v14, %v1854_v4  ;;  %v707_v44 = vmul.f32 %v2676_v14, %v1831_v60  ;;  %v620_v51 = vsel %vm519_vm0, %v618_v31, %v619_v26  ;;  %v1053_v35 = vmul.f32 %v2301_v55, %v1779_v41  ;;  %v2679_v38 = vld [vmem:[#allocation2_spill] sm:$0xff]  ;;  %v2343_v26 = vpop.permute.xlu1 %1114 }
 0x107   : > { %v1054_v5 = vmul.f32 %v2301_v55, %v1810_v50  ;;  %v596_v40 = vmul.f32 %v2678_v15, %v2677_v52  ;;  %v597_v24 = vmul.f32 %v2678_v15, %v2679_v38  ;;  %v617_v20 = vsel %vm519_vm0, %v615_v2, %v616_v49 }
 0x108   : > { %v723_v37 = vrot.slane %v706_v29, 1  ;;  %v724_v34 = vrot.slane %v707_v44, 1  ;;  %v1069_v19 = vrot.slane %v1053_v35, 2  ;;  %v907_v13 = vmul.f32 %v2681_v9, %v2680_v21 }
 0x109   : > { %v1070_v50 = vrot.slane %v1054_v5, 2  ;;  %v612_v36 = vrot.slane %v596_v40, 1  ;;  %v613_v27 = vrot.slane %v597_v24, 1  ;;  %v908_v63 = vmul.f32 %v2681_v9, %v2682_v7  ;;  %v2687_v40 = vld [vmem:[#allocation8_spill] sm:$0xff] }
 0x10a   : > { %v725_v43 = vsel %vm519_vm0, %v723_v37, %v724_v34  ;;  %v602_v45 = vmul.f32 %v2683_v33, %v2680_v21  ;;  %v603_v3 = vmul.f32 %v2683_v33, %v2682_v7  ;;  %v704_v53 = vmul.f32 %v2684_v42, %v2677_v52  ;;  %v2688_v24 = vld [vmem:[#allocation16_spill] sm:$0xff]  ;;  %v2689_v37 = vld [vmem:[#allocation3_spill] sm:$0xff]  ;;  %v2690_v33 = vld [vmem:[#allocation17_spill] sm:$0xff] }
 0x10b   : > { %v1071_v6 = vsel %vm824_vm1, %v1069_v19, %v1070_v50  ;;  %v705_v17 = vmul.f32 %v2684_v42, %v2679_v38  ;;  %v614_v57 = vsel %vm519_vm0, %v612_v36, %v613_v27  ;;  %v926_v59 = vrot.slane %v907_v13, 2 }
 0x10c   : > { %626 = vrot.lane.b32.xlu1 %v617_v20, %s1649_s30  ;;  %v927_v48 = vrot.slane %v908_v63, 2  ;;  %v621_v22 = vrot.slane %v602_v45, 1  ;;  %v622_v31 = vrot.slane %v603_v3, 1  ;;  %v720_v2 = vrot.slane %v704_v53, 1  ;;  %v2691_v53 = vld [vmem:[#allocation12_spill] sm:$0xff] }
 0x10d   : > { %628 = vrot.lane.b32.xlu2 %v620_v51, %s1649_s30  ;;  %v721_v49 = vrot.slane %v705_v17, 1  ;;  %v2686_v51 = vld [vmem:[#allocation10_spill] sm:$0xff]  ;;  %v905_v20 = vmul.f32 %v2688_v24, %v2687_v40  ;;  %v906_v34 = vmul.f32 %v2688_v24, %v2689_v37  ;;  %v1013_v45 = vmul.f32 %v2690_v33, %v2687_v40 }
 0x10e   : > { %1083 = vrot.lane.b32.xlu0 %v1074_v39, %s1650_s10  ;;  %v2685_v39 = vld [vmem:[#allocation19_spill] sm:$0xff]  ;;  %v928_v44 = vsel %vm824_vm1, %v926_v59, %v927_v48  ;;  %v710_v35 = vmul.f32 %v2686_v51, %v2680_v21  ;;  %v711_v5 = vmul.f32 %v2686_v51, %v2682_v7  ;;  %v623_v15 = vsel %vm519_vm0, %v621_v22, %v622_v31  ;;  %v2369_v42 = vpop.permute.xlu1 %1110 }
 0x10f   : > { %v1015_v14 = vmul.f32 %v2685_v39, %v2680_v21  ;;  %v1016_v29 = vmul.f32 %v2685_v39, %v2682_v7  ;;  %v722_v19 = vsel %vm519_vm0, %v720_v2, %v721_v49  ;;  %v325_v7 = vstv %s1765_s22  ;;  %s1657_s22 = smov 80  }
 0x110   : > { %v729_v9 = vrot.slane %v710_v35, 1  ;;  %v730_v13 = vrot.slane %v711_v5, 1  ;;  %v923_v63 = vrot.slane %v905_v20, 2  ;;  %v1014_v3 = vmul.f32 %v2690_v33, %v2689_v37 }
 0x111   : > { %v1034_v36 = vrot.slane %v1015_v14, 2  ;;  %v1035_v27 = vrot.slane %v1016_v29, 2  ;;  %v708_v17 = vmul.f32 %v2691_v53, %v2687_v40  ;;  %v336_v48 = vmul.f32 %v325_v7, %v1854_v4 }
 0x112   : > { %v731_v59 = vsel %vm519_vm0, %v729_v9, %v730_v13  ;;  %v1011_v22 = vmul.f32 %v2182_v10, %v1854_v4  ;;  %v1012_v31 = vmul.f32 %v2182_v10, %v1831_v60  ;;  %v1031_v39 = vrot.slane %v1013_v45, 2  ;;  %v2692_v10 = vld [vmem:[#allocation15_spill] sm:$0xff] }
 0x113   : > { %v1032_v14 = vrot.slane %v1014_v3, 2  ;;  %v321_v35 = vstv %s1763_s21  ;;  %v333_v24 = vstv %s1770_s27  ;;  %s1656_s21 = smov 48   ;;  %s1659_s27 = smov 96  }
 0x114   : > { %624 = vrot.lane.b32.xlu1 %v614_v57, %s1649_s30  ;;  %v709_v57 = vmul.f32 %v2691_v53, %v2689_v37  ;;  %v1028_v5 = vrot.slane %v1011_v22, 2  ;;  %v344_v37 = vmul.f32 %v325_v7, %v1779_v41  ;;  %v346_v13 = vmul.f32 %v333_v24, %v1779_v41 }
 0x115   : > { %734 = vrot.lane.b32.xlu2 %v725_v43, %s1650_s10  ;;  %v924_v43 = vrot.slane %v906_v34, 2  ;;  %v1033_v20 = vsel %vm824_vm1, %v1031_v39, %v1032_v14  ;;  %v903_v34 = vmul.f32 %v2692_v10, %v1854_v4  ;;  %v329_v39 = vstv %s1768_s26  ;;  %s1658_s26 = smov 16  }
 0x116   : > { %1081 = vrot.lane.b32.xlu0 %v1071_v6, %s1650_s10  ;;  %v1036_v6 = vsel %vm824_vm1, %v1034_v36, %v1035_v27  ;;  %v727_v51 = vrot.slane %v709_v57, 1  ;;  %v335_v27 = vmul.f32 %v321_v35, %v2677_v52 }
 0x117   : > { %v2340_v61 = vpop.permute.xlu2 %407  ;;  %v925_v2 = vsel %vm824_vm1, %v923_v63, %v924_v43  ;;  %v920_v33 = vrot.slane %v903_v34, 2 }
 0x11c   : > { %732 = vrot.lane.b32.xlu1 %v722_v19, %s1650_s10  ;;  %v904_v19 = vmul.f32 %v2692_v10, %v1831_v60 }
 0x11d   : > { %935 = vrot.lane.b32.xlu2 %v928_v44, %s1649_s30  ;;  %v726_v44 = vrot.slane %v708_v17, 1  ;;  %v2693_v17 = vld [vmem:[#allocation18_spill] sm:$0xff] }
 0x11e   : > { %630 = vrot.lane.b32.xlu0 %v623_v15, %s1649_s30  ;;  %v1029_v15 = vrot.slane %v1012_v31, 2  ;;  %v921_v45 = vrot.slane %v904_v19, 2  ;;  %v901_v57 = vmul.f32 %v2693_v17, %v2677_v52 }
 0x11f   : > { %v474_v50 = vpop.permute.xlu2 %473  ;;  %v728_v36 = vsel %vm519_vm0, %v726_v44, %v727_v51  ;;  %v343_v51 = vmul.f32 %v321_v35, %v1779_v41 }
 0x120   : > { %v1030_v63 = vsel %vm824_vm1, %v1028_v5, %v1029_v15  ;;  %v917_v14 = vrot.slane %v901_v57, 2  ;;  %v345_v15 = vmul.f32 %v329_v39, %v1779_v41 }
 0x124   : > { %933 = vrot.lane.b32.xlu1 %v925_v2, %s1649_s30 }
 0x125   : > { %1043 = vrot.lane.b32.xlu2 %v1036_v6, %s1650_s10 }
 0x126   : > { %738 = vrot.lane.b32.xlu0 %v731_v59, %s1650_s10  ;;  %v902_v59 = vmul.f32 %v2693_v17, %v2679_v38 }
 0x127   : > { %v382_v49 = vpop.permute.xlu2 %381 }
 0x128   : > { %v2385_v29 = vadd.f32 %v382_v49, %v336_v48  ;;  %v922_v48 = vsel %vm824_vm1, %v920_v33, %v921_v45  ;;  %v918_v44 = vrot.slane %v902_v59, 2 }
 0x12a   : > { %v919_v34 = vsel %vm824_vm1, %v917_v14, %v918_v44 }
 0x12c   : > { %1039 = vrot.lane.b32.xlu1 %v1030_v63, %s1650_s10 }
 0x12d   : > { %1041 = vrot.lane.b32.xlu2 %v1033_v20, %s1650_s10  ;;  %v1009_v20 = vmul.f32 %v2301_v55, %v2677_v52 }
 0x12e   : > { %736 = vrot.lane.b32.xlu0 %v728_v36, %s1650_s10  ;;  %v406_v9 = vpop.permute.xlu1 %405 }
 0x12f   : > { %v416_v7 = vadd.f32 %v406_v9, %v344_v37  ;;  %v380_v43 = vpop.permute.xlu2 %379  ;;  %v1010_v37 = vmul.f32 %v2301_v55, %v2679_v38 }
 0x130   : > { %v410_v4 = vpop.permute.xlu0 %409  ;;  %v391_v60 = vadd.f32 %v380_v43, %v335_v27 }
 0x131   : > { %v418_v3 = vadd.f32 %v410_v4, %v346_v13  ;;  %v484_v6 = vadd.f32 %v474_v50, %v416_v7  ;;  %v1026_v9 = vrot.slane %v1010_v37, 2  ;;  %v338_v7 = vmul.f32 %v333_v24, %v2680_v21 }
 0x133   : > { %v573_v53 = vadd.f32 %v2220_v18, %v484_v6 }
 0x136   : > { %931 = vrot.lane.b32.xlu0 %v922_v48, %s1649_s30  ;;  %v404_v22 = vpop.permute.xlu1 %403 }
 0x137   : > { %v448_v31 = vpop.permute.xlu2 %447  ;;  %v415_v10 = vadd.f32 %v404_v22, %v343_v51 }
 0x138   : > { %v478_v2 = vpop.permute.xlu0 %477  ;;  %v459_v49 = vadd.f32 %v448_v31, %v391_v60 }
 0x139   : > { %v486_v50 = vadd.f32 %v478_v2, %v418_v3 }
 0x13a   : > { %v2411_v18 = vadd.f32 %v2262_v12, %v459_v49  ;;  %v417_v12 = vadd.f32 %v2340_v61, %v345_v15 }
 0x13b   : > { %v575_v5 = vadd.f32 %v2205_v23, %v486_v50  ;;  %v1025_v23 = vrot.slane %v1009_v20, 2 }
 0x13d   : > { %v1027_v55 = vsel %vm824_vm1, %v1025_v23, %v1026_v9 }
 0x13e   : > { %929 = vrot.lane.b32.xlu0 %v919_v34, %s1649_s30  ;;  %v472_v19 = vpop.permute.xlu1 %471  ;;  %s1654_s30 = smov 64  }
 0x13f   : > { %v483_v36 = vadd.f32 %v472_v19, %v415_v10  ;;  %v675_v35 = vpop.permute.xlu2 %674 }
 0x140   : > { %v476_v27 = vpop.permute.xlu0 %475  ;;  %v683_v38 = vadd.f32 %v675_v35, %v575_v5 }
 0x141   : > { %v485_v41 = vadd.f32 %v476_v27, %v417_v12  ;;  %v572_v13 = vadd.f32 %v2232_v47, %v483_v36 }
 0x143   : > { %v574_v52 = vadd.f32 %v2213_v30, %v485_v41  ;;  %v337_v30 = vmul.f32 %v329_v39, %v2687_v40 }
 0x146   : > { %1037 = vrot.lane.b32.xlu0 %v1027_v55, %s1650_s10  ;;  %v454_v63 = vpop.permute.xlu1 %453  ;;  %s1655_s10 = smov 32  }
 0x147   : > { %v783_v43 = vpop.permute.xlu2 %782 }
 0x148   : > { %v386_v61 = vpop.permute.xlu0 %385  ;;  %v791_v4 = vadd.f32 %v783_v43, %v683_v38 }
 0x149   : > { %v394_v60 = vadd.f32 %v386_v61, %v338_v7 }
 0x14a   : > { %v880_v33 = vadd.f32 %v2223_v28, %v791_v4 }
 0x14b   : > { %v462_v45 = vadd.f32 %v454_v63, %v394_v60 }
 0x14d   : > { %v2430_v3 = vadd.f32 %v2269_v16, %v462_v45 }
 0x14e   : > { %v452_v47 = vpop.permute.xlu1 %451 }
 0x14f   : > { %v781_v48 = vpop.permute.xlu2 %780 }
 0x150   : > { %v384_v6 = vpop.permute.xlu0 %383 }
 0x151   : > { %v393_v17 = vadd.f32 %v384_v6, %v337_v30 }
 0x153   : > { %v461_v57 = vadd.f32 %v452_v47, %v393_v17 }
 0x155   : > { %v2434_v59 = vadd.f32 %v2239_v25, %v461_v57 }
 0x156   : > { %v673_v21 = vpop.permute.xlu1 %672 }
 0x157   : > { %v682_v24 = vadd.f32 %v673_v21, %v574_v52  ;;  %v976_v50 = vpop.permute.xlu2 %975 }
 0x158   : > { %v450_v22 = vpop.permute.xlu0 %449 }
 0x159   : > { %v790_v31 = vadd.f32 %v781_v48, %v682_v24  ;;  %v460_v28 = vadd.f32 %v450_v22, %v2385_v29 }
 0x15b   : > { %v879_v2 = vadd.f32 %v2245_v56, %v790_v31  ;;  %v537_v16 = vadd.f32 %v2252_v32, %v460_v28  ;;  %v1653_v31 = vmov 1934713408  }
 0x15c   : > { %v1227_v28 = vunpack.c.l.s4 %v1653_v31 }
 0x15e   : > { %v779_v49 = vpop.permute.xlu1 %778 }
 0x15f   : > { %v974_v15 = vpop.permute.xlu2 %973 }
 0x160   : > { %v671_v14 = vpop.permute.xlu0 %670 }
 0x161   : > { %v681_v40 = vadd.f32 %v671_v14, %v573_v53 }
 0x163   : > { %v789_v39 = vadd.f32 %v779_v49, %v681_v40 }
 0x165   : > { %v878_v44 = vadd.f32 %v2255_v8, %v789_v39 }
 0x166   : > { %v980_v25 = vpop.permute.xlu1 %979 }
 0x167   : > { %v988_v34 = vadd.f32 %v980_v25, %v880_v33  ;;  %v2441_v32 = vpop.permute.xlu2 %628  ;;  %v986_v8 = vadd.f32 %v976_v50, %v878_v44  ;;  %v2470_v44 = vunpack.c.0.s8 %v1227_v28 }
 0x168   : > { %v669_v51 = vpop.permute.xlu0 %668 }
 0x169   : > { %v680_v5 = vadd.f32 %v669_v51, %v572_v13  ;;  %v1652_v13 = vmov 1983009808  }
 0x16a   : > { %v1203_v52 = vunpack.c.l.s4 %v1652_v13 }
 0x16c   : > { %v2450_v60 = vunpack.c.0.s8 %v1203_v52 }
 0x16e   : > { %v1088_v10 = vpop.permute.xlu1 %1087 }
 0x16f   : > { %v1096_v56 = vadd.f32 %v1088_v10, %v988_v34  ;;  %v735_v63 = vpop.permute.xlu2 %734 }
 0x170   : > { %v777_v20 = vpop.permute.xlu0 %776 }
 0x171   : > { %v788_v37 = vadd.f32 %v777_v20, %v680_v5  ;;  %v1132_v53 = vadd.f32 %v2225_v58, %v1096_v56 }
 0x173   : > { %v877_v29 = vadd.f32 %v2242_v11, %v788_v37  ;;  %v2444_v35 = vmax.f32 %v1132_v53, 1e-08  ;;  %v1308_v11 = vrot.slane %v1132_v53, 4 }
 0x175   : > { %1633 = vrcp.f32 %v2444_v35  ;;  %v985_v45 = vadd.f32 %v974_v15, %v877_v29  ;;  %vm1184_vm4 = vweird.f32 %v2444_v35  ;;  %v1188_v28 = vand.u32 2147483647, %v2444_v35 }
 0x176   : > { %v1086_v12 = vpop.permute.xlu1 %1085 }
 0x177   : > { %v936_v29 = vpop.permute.xlu2 %935  ;;  %vm1189_vm6 = vcmp.eq.f32.partialorder %v1188_v28, 8.507059e+37 }
 0x178   : > { %v978_v19 = vpop.permute.xlu0 %977 }
 0x179   : > { %v987_v36 = vadd.f32 %v978_v19, %v879_v2 }
 0x17b   : > { %v1095_v9 = vadd.f32 %v1086_v12, %v987_v36  ;;  %v2456_v17 = vpop.eup %1633 }
 0x17c   : > { %vm1185_vm3 = vweird.f32 %v2456_v17 }
 0x17d   : > { %v1131_v4 = vadd.f32 %v2314_v0, %v1095_v9  ;;  %vm1186_vm5 = vmor %vm1184_vm4, %vm1185_vm3  ;;  %vm1282_vm4 = vcmask 130048  }
 0x17e   : > { %v627_v41 = vpop.permute.xlu1 %626 }
 0x17f   : > { %v637_v55 = vadd.f32 %v627_v41, %v537_v16  ;;  %v2458_v57 = vmax.f32 %v1131_v4, 1e-08  ;;  %v1296_v48 = vrot.slane %v1131_v4, 4 }
 0x180   : > { %v1084_v27 = vpop.permute.xlu0 %1083 }
 0x181   : > { %v1094_v23 = vadd.f32 %v1084_v27, %v986_v8  ;;  %v745_v7 = vadd.f32 %v735_v63, %v637_v55  ;;  %1635 = vrcp.f32 %v2458_v57  ;;  %vm1170_vm8 = vweird.f32 %v2458_v57 }
 0x183   : > { %v1130_v38 = vadd.f32 %v2343_v26, %v1094_v23  ;;  %v2454_v47 = vadd.f32 %v2283_v1, %v745_v7  ;;  %v1180_v1 = vmul.f32 %v2456_v17, %v2444_v35 }
 0x185   : > { %v1309_v43 = vsel %vm1198_vm2, %v1308_v11, %v1130_v38  ;;  %v1310_v61 = vrot.slane %v1130_v38, 4  ;;  %v2467_v14 = vmax.f32 %v1130_v38, 1e-08  ;;  %v1181_v10 = vsub.f32 1.0, %v1180_v1 }
 0x186   : > { %v1315_v21 = vperm.slane %v1309_v43, %v2450_v60  ;;  %v625_v24 = vpop.permute.xlu1 %624 }
 0x187   : > { %v1311_v33 = vsel %vm1198_vm2, %v1132_v53, %v1310_v61  ;;  %v636_v37 = vadd.f32 %v625_v24, %v2411_v18  ;;  %1637 = vrcp.f32 %v2467_v14  ;;  %v2481_v8 = vpop.eup %1635  ;;  %v1182_v41 = vmul.f32 %v2456_v17, %v1181_v10 }
 0x188   : > { %v1082_v30 = vpop.permute.xlu0 %1081  ;;  %v1319_v2 = vperm.slane %v1311_v33, %v2450_v60  ;;  %v1320_v40 = vrot.slane %v1315_v21, 4  ;;  %v1166_v52 = vmul.f32 %v2481_v8, %v2458_v57  ;;  %vm1171_vm7 = vweird.f32 %v2481_v8 }
 0x189   : > { %v1093_v6 = vadd.f32 %v1082_v30, %v985_v45  ;;  %v1183_v33 = vadd.f32 %v2456_v17, %v1182_v41  ;;  %v1044_v30 = vpop.permute.xlu2 %1043  ;;  %vm1172_vm9 = vmor %vm1170_vm8, %vm1171_vm7  ;;  %vm1156_vm12 = vweird.f32 %v2467_v14  ;;  %vm1290_vm7 = vcmask 654336  }
 0x18a   : > { %v1332_v5 = vrot.slane %v1319_v2, 4  ;;  %vm1292_vm8 = vcmask 785408  }
 0x18b   : > { %v1129_v22 = vadd.f32 %v2369_v42, %v1093_v6 }
 0x18d   : > { %v1297_v16 = vsel %vm1198_vm2, %v1296_v48, %v1129_v22  ;;  %v1298_v49 = vrot.slane %v1129_v22, 4  ;;  %v2500_v63 = vpop.eup %1637  ;;  %v2509_v6 = vmax.f32 %v1129_v22, 1e-08 }
 0x18e   : > { %v1303_v39 = vperm.slane %v1297_v16, %v2450_v60  ;;  %v733_v34 = vpop.permute.xlu1 %732  ;;  %v1152_v45 = vmul.f32 %v2500_v63, %v2467_v14  ;;  %vm1157_vm10 = vweird.f32 %v2500_v63 }
 0x18f   : > { %v1299_v50 = vsel %vm1198_vm2, %v1131_v4, %v1298_v49  ;;  %v744_v12 = vadd.f32 %v733_v34, %v636_v37  ;;  %v1167_v4 = vsub.f32 1.0, %v1166_v52  ;;  %1639 = vrcp.f32 %v2509_v6  ;;  %vm1158_vm13 = vmor %vm1156_vm12, %vm1157_vm10 }
 0x190   : > { %v631_v25 = vpop.permute.xlu0 %630  ;;  %v1307_v51 = vperm.slane %v1299_v50, %v2450_v60  ;;  %v1322_v15 = vrot.slane %v1303_v39, 4  ;;  %v1321_v20 = vsel %vm1198_vm2, %v1320_v40, %v1303_v39  ;;  %v1153_v16 = vsub.f32 1.0, %v1152_v45 }
 0x191   : > { %v2484_v27 = vperm.slane %v1321_v20, %v2470_v44  ;;  %v2489_v9 = vadd.f32 %v2290_v46, %v744_v12  ;;  %v639_v11 = vadd.f32 %v631_v25, %v2430_v3  ;;  %v1168_v1 = vmul.f32 %v2481_v8, %v1167_v4  ;;  %v1042_v37 = vpop.permute.xlu2 %1041 }
 0x192   : > { %v1333_v56 = vsel %vm1198_vm2, %v1332_v5, %v1307_v51  ;;  %v1323_v19 = vsel %vm1198_vm2, %v1315_v21, %v1322_v15  ;;  %v1334_v18 = vrot.slane %v1307_v51, 4  ;;  %v1190_v21 = vand.u32 2147483648, %v2444_v35 }
 0x193   : > { %v1339_v53 = vperm.slane %v1333_v56, %v2470_v44  ;;  %v1331_v36 = vperm.slane %v1323_v19, %v2470_v44  ;;  %v1344_v43 = vrot.slane %v2484_v27, 4  ;;  %v1154_v51 = vmul.f32 %v2500_v63, %v1153_v16 }
 0x194   : > { %v1335_v13 = vsel %vm1198_vm2, %v1319_v2, %v1334_v18  ;;  %v1187_v2 = vsel %vm1186_vm5, %v2456_v17, %v1183_v33  ;;  %v1191_v35 = vor.u32 1.1754944e-38, %v1190_v21  ;;  %v1169_v17 = vadd.f32 %v2481_v8, %v1168_v1 }
 0x195   : > { %1365 = vrot.lane.b32.xlu2 %v1339_v53, %s1654_s30  ;;  %1357 = vrot.lane.b32.xlu1 %v1331_v36, %s1655_s10  ;;  %v1346_v23 = vrot.slane %v1331_v36, 4  ;;  %v2498_v38 = vperm.slane %v1335_v13, %v2470_v44  ;;  %v1348_v46 = vrot.slane %v1339_v53, 4  ;;  %v1345_v48 = vsel %vm1198_vm2, 0.0, %v1344_v43 }
 0x196   : > { %v934_v49 = vpop.permute.xlu1 %933  ;;  %v1192_v25 = vsel %vm1189_vm6, %v1191_v35, %v1187_v2  ;;  %v1174_v5 = vand.u32 2147483647, %v2458_v57  ;;  %v1176_v15 = vand.u32 2147483648, %v2458_v57  ;;  %v1155_v34 = vadd.f32 %v2500_v63, %v1154_v51 }
 0x197   : > { %v1347_v55 = vsel %vm1198_vm2, 0.0, %v1346_v23  ;;  %v1349_v24 = vsel %vm1198_vm2, 0.0, %v1348_v46  ;;  %v1162_v19 = vand.u32 2147483648, %v2467_v14  ;;  %v1160_v53 = vand.u32 2147483647, %v2467_v14 }
 0x198   : > { %v739_v7 = vpop.permute.xlu0 %738  ;;  %1361 = vrot.lane.b32.xlu0 %v1347_v55, %s1656_s21  ;;  %vm1175_vm11 = vcmp.eq.f32.partialorder %v1174_v5, 8.507059e+37  ;;  %v1159_v13 = vsel %vm1158_vm13, %v2500_v63, %v1155_v34  ;;  %v1148_v33 = vand.u32 2147483648, %v2509_v6  ;;  %vm1142_vm0 = vweird.f32 %v2509_v6 }
 0x199   : > { %v747_v61 = vadd.f32 %v739_v7, %v639_v11  ;;  %v1163_v52 = vor.u32 1.1754944e-38, %v1162_v19  ;;  %vm1161_vm14 = vcmp.eq.f32.partialorder %v1160_v53, 8.507059e+37  ;;  %vm1284_vm5 = vcmask 261120  }
 0x19a   : > { %vm1288_vm6 = vcmask 523264   ;;  %vm1393_vm10 = vcmask 1043456  }
 0x19b   : > { %v844_v3 = vadd.f32 %v2273_v54, %v747_v61  ;;  %v638_v54 = vadd.f32 %v2441_v32, %v2434_v59  ;;  %v1164_v7 = vsel %vm1161_vm14, %v1163_v52, %v1159_v13 }
 0x19d   : > { %v944_v31 = vadd.f32 %v936_v29, %v844_v3  ;;  %1369 = vrot.lane.b32.xlu1 %v1349_v24, %s1657_s22  ;;  %1353 = vrot.lane.b32.xlu2 %v1345_v48, %s1658_s26  ;;  %v1173_v29 = vsel %vm1172_vm9, %v2481_v8, %v1169_v17  ;;  %v1149_v24 = vor.u32 1.1754944e-38, %v1148_v33  ;;  %vm1294_vm9 = vcmask 916480  }
 0x19e   : > { %v1040_v18 = vpop.permute.xlu1 %1039 }
 0x19f   : > { %v1052_v22 = vadd.f32 %v1044_v30, %v944_v31 }
 0x1a0   : > { %v737_v40 = vpop.permute.xlu0 %736 }
 0x1a1   : > { %v1128_v39 = vadd.f32 %v2225_v58, %v1052_v22  ;;  %v746_v50 = vadd.f32 %v737_v40, %v638_v54  ;;  %v1640_v58 = vpop.eup %1639 }
 0x1a2   : > { %v1138_v36 = vmul.f32 %v1640_v58, %v2509_v6  ;;  %vm1143_vm15 = vweird.f32 %v1640_v58 }
 0x1a3   : > { %v1196_v59 = vmul.f32 %v1192_v25, %v1128_v39  ;;  %v843_v32 = vadd.f32 %v2276_v62, %v746_v50  ;;  %v1177_v62 = vor.u32 1.1754944e-38, %v1176_v15  ;;  %vm1144_vm1 = vmor %vm1142_vm0, %vm1143_vm15 }
 0x1a4   : > { %v1139_v55 = vsub.f32 1.0, %v1138_v36 }
 0x1a5   : > { %v943_v20 = vadd.f32 %v934_v49, %v843_v32  ;;  %v1178_v8 = vsel %vm1175_vm11, %v1177_v62, %v1173_v29  ;;  %vm1389_vm11 = vcmask 31744  }
 0x1a6   : > { %v1140_v14 = vmul.f32 %v1640_v58, %v1139_v55 }
 0x1a7   : > { %v1051_v10 = vadd.f32 %v1042_v37, %v943_v20 }
 0x1a8   : > { %v932_v56 = vpop.permute.xlu0 %931  ;;  %v1141_v3 = vadd.f32 %v1640_v58, %v1140_v14 }
 0x1a9   : > { %v1127_v12 = vadd.f32 %v2314_v0, %v1051_v10  ;;  %v942_v57 = vadd.f32 %v932_v56, %v2454_v47  ;;  %v1210_v0 = vrot.slane %v1196_v59, 4 }
 0x1aa   : > { %v1145_v21 = vsel %vm1144_vm1, %v1640_v58, %v1141_v3 }
 0x1ab   : > { %v1195_v23 = vmul.f32 %v1178_v8, %v1127_v12  ;;  %v1050_v41 = vadd.f32 %v1040_v18, %v942_v57  ;;  %v1443_v57 = vld [vmem:[%s2600_s6] sm:$0xff] }
 0x1ad   : > { %v1126_v11 = vadd.f32 %v2343_v26, %v1050_v41  ;;  %v1146_v26 = vand.u32 2147483647, %v2509_v6  ;;  %v1197_v54 = vrot.slane %v1195_v23, 4 }
 0x1af   : > { %v1194_v46 = vmul.f32 %v1164_v7, %v1126_v11  ;;  %vm1147_vm3 = vcmp.eq.f32.partialorder %v1146_v26, 8.507059e+37 }
 0x1b0   : > { %v930_v47 = vpop.permute.xlu0 %929  ;;  %v1150_v31 = vsel %vm1147_vm3, %v1149_v24, %v1145_v21  ;;  %v1388_v21 = vld [vmem:[%s2599_s5] sm:$0xff] }
 0x1b1   : > { %v1212_v43 = vrot.slane %v1194_v46, 4  ;;  %v1211_v61 = vsel %vm1198_vm2, %v1210_v0, %v1194_v46  ;;  %v941_v63 = vadd.f32 %v930_v47, %v2489_v9 }
 0x1b2   : > { %v1217_v28 = vperm.slane %v1211_v61, %v2450_v60 }
 0x1b3   : > { %v1213_v4 = vsel %vm1198_vm2, %v1196_v59, %v1212_v43 }
 0x1b4   : > { %v1221_v2 = vperm.slane %v1213_v4, %v2450_v60  ;;  %v1222_v16 = vrot.slane %v1217_v28, 4 }
 0x1b6   : > { %v1234_v40 = vrot.slane %v1221_v2, 4 }
 0x1b8   : > { %v1038_v45 = vpop.permute.xlu0 %1037 }
 0x1b9   : > { %v1049_v30 = vadd.f32 %v1038_v45, %v941_v63 }
 0x1bb   : > { %v1125_v48 = vadd.f32 %v2369_v42, %v1049_v30 }
 0x1bd   : > { %v1193_v22 = vmul.f32 %v1150_v31, %v1125_v48 }
 0x1bf   : > { %v1199_v9 = vsel %vm1198_vm2, %v1197_v54, %v1193_v22  ;;  %v1200_v1 = vrot.slane %v1193_v22, 4 }
 0x1c0   : > { %v1205_v6 = vperm.slane %v1199_v9, %v2450_v60 }
 0x1c1   : > { %v1201_v35 = vsel %vm1198_vm2, %v1195_v23, %v1200_v1 }
 0x1c2   : > { %v1209_v49 = vperm.slane %v1201_v35, %v2450_v60  ;;  %v1224_v42 = vrot.slane %v1205_v6, 4  ;;  %v1223_v39 = vsel %vm1198_vm2, %v1222_v16, %v1205_v6 }
 0x1c3   : > { %v1229_v5 = vperm.slane %v1223_v39, %v2470_v44 }
 0x1c4   : > { %v1235_v50 = vsel %vm1198_vm2, %v1234_v40, %v1209_v49  ;;  %v1225_v25 = vsel %vm1198_vm2, %v1217_v28, %v1224_v42  ;;  %v1236_v59 = vrot.slane %v1209_v49, 4 }
 0x1c5   : > { %v1241_v32 = vperm.slane %v1235_v50, %v2470_v44  ;;  %v1233_v17 = vperm.slane %v1225_v25, %v2470_v44  ;;  %v1246_v20 = vrot.slane %v1229_v5, 4 }
 0x1c6   : > { %v1237_v51 = vsel %vm1198_vm2, %v1221_v2, %v1236_v59 }
 0x1c7   : > { %1267 = vrot.lane.b32.xlu1 %v1241_v32, %s1654_s30  ;;  %1259 = vrot.lane.b32.xlu0 %v1233_v17, %s1655_s10  ;;  %v1245_v60 = vperm.slane %v1237_v51, %v2470_v44  ;;  %v1250_v15 = vrot.slane %v1241_v32, 4  ;;  %v1248_v58 = vrot.slane %v1233_v17, 4  ;;  %v1247_v10 = vsel %vm1198_vm2, 0.0, %v1246_v20 }
 0x1c8   : > { %v1350_v44 = vrot.slane %v2498_v38, 4 }
 0x1c9   : > { %1275 = vrot.lane.b32.xlu2 %v1245_v60, %s1659_s27  ;;  %v1251_v37 = vsel %vm1198_vm2, 0.0, %v1250_v15  ;;  %v1249_v29 = vsel %vm1198_vm2, 0.0, %v1248_v58  ;;  %v1252_v34 = vrot.slane %v1245_v60, 4 }
 0x1ca   : > { %v1351_v56 = vsel %vm1198_vm2, 0.0, %v1350_v44 }
 0x1cb   : > { %v1253_v62 = vsel %vm1198_vm2, 0.0, %v1252_v34  ;;  %vm1286_vm2 = vcmask 392192  }
 0x1cf   : > { %1271 = vrot.lane.b32.xlu0 %v1251_v37, %s1657_s22  ;;  %1255 = vrot.lane.b32.xlu1 %v1247_v10, %s1658_s26 }
 0x1d1   : > { %1263 = vrot.lane.b32.xlu2 %v1249_v29, %s1656_s21 }
 0x1d7   : > { %1373 = vrot.lane.b32.xlu0 %v2498_v38, %s1659_s27  ;;  %1279 = vrot.lane.b32.xlu1 %v1253_v62, %s1660_s19 }
 0x1d9   : > { %1377 = vrot.lane.b32.xlu2 %v1351_v56, %s1660_s19 }
 0x1df   : > { %1446 = vperm.xlu0 %1628, %v1443_v57  }
 0x1ef   : > { %v1366_v19 = vpop.permute.xlu2 %1365 }
 0x1f7   : > { %v1354_v53 = vpop.permute.xlu2 %1353 }
 0x1f8   : > { %v1380_v55 = vsel %vm1282_vm4, %v2484_v27, %v1354_v53  ;;  %v1387_v27 = vld [vmem:[%s2598_s4] sm:$0xff] }
 0x207   : > { %v1358_v12 = vpop.permute.xlu1 %1357 }
 0x208   : > { %v1381_v0 = vsel %vm1284_vm5, %v1380_v55, %v1358_v12 }
 0x20a   : > { %v1362_v36 = vpop.permute.xlu0 %1361 }
 0x20b   : > { %v1382_v47 = vsel %vm1286_vm2, %v1381_v0, %v1362_v36 }
 0x20c   : > { %v1383_v61 = vsel %vm1288_vm6, %v1382_v47, %v1366_v19 }
 0x20f   : > { %v1370_v8 = vpop.permute.xlu1 %1369 }
 0x210   : > { %v1384_v4 = vsel %vm1290_vm7, %v1383_v61, %v1370_v8 }
 0x223   : > { %v1276_v18 = vpop.permute.xlu2 %1275 }
 0x22b   : > { %v1264_v38 = vpop.permute.xlu2 %1263 }
 0x233   : > { %v1378_v26 = vpop.permute.xlu2 %1377 }
 0x239   : > { %v1268_v23 = vpop.permute.xlu1 %1267  ;;  %v1260_v41 = vpop.permute.xlu0 %1259 }
 0x241   : > { %v1272_v13 = vpop.permute.xlu0 %1271  ;;  %v1256_v52 = vpop.permute.xlu1 %1255 }
 0x242   : > { %v1283_v11 = vsel %vm1282_vm4, %v1229_v5, %v1256_v52 }
 0x243   : > { %v1285_v7 = vsel %vm1284_vm5, %v1283_v11, %v1260_v41 }
 0x244   : > { %v1287_v46 = vsel %vm1286_vm2, %v1285_v7, %v1264_v38 }
 0x245   : > { %v1289_v43 = vsel %vm1288_vm6, %v1287_v46, %v1268_v23 }
 0x246   : > { %v1291_v14 = vsel %vm1290_vm7, %v1289_v43, %v1272_v13 }
 0x247   : > { %v1293_v63 = vsel %vm1292_vm8, %v1291_v14, %v1276_v18 }
 0x249   : > { %v1374_v3 = vpop.permute.xlu0 %1373  ;;  %v1280_v33 = vpop.permute.xlu1 %1279 }
 0x24a   : > { %v1385_v45 = vsel %vm1292_vm8, %v1384_v4, %v1374_v3  ;;  %v1295_v30 = vsel %vm1294_vm9, %v1293_v63, %v1280_v33 }
 0x24b   : > { %1528 = vmatpush.msk.msra.mxu1 %vm1393_vm10, %v1295_v30  ;;  %v1386_v24 = vsel %vm1294_vm9, %v1385_v45, %v1378_v26 }
 0x24c   : > { %1526 = vmatpush.msk.msra.mxu0 %vm1393_vm10, %v1386_v24  ;;  %1529 = vmatmul.msk.f32.vlgmr.msra.gmra.mxu1 %vm1389_vm11, %v1387_v27 }
 0x24d   : > { %1527 = vmatmul.msk.f32.vlgmr.msra.gmra.mxu0 %vm1389_vm11, %v1388_v21 }
 0x251   : > { %v1447_v28 = vpop.permute.xlu0 %1446 }
 0x2c9   : > { %v1440_v48 = vpop.f32.mrf.mxu1 }
 0x2ca   : > { %v1414_v31 = vpop.f32.mrf.mxu0 }
 0x2cb   : > { %v1441_v54 = vadd.f32 %v1440_v48, %v1414_v31 }
 0x2cd   : > { %v1449_v22 = vadd.f32 %v1447_v28, %v1441_v54 }
 0x2cf   : > { %1450 = vst [vmem:[%s296_s11] sm:$0xff] %v1449_v22 }
 0x2d0 PF: > { %s17_s24 = sadd.s32 1, %s1647_s24  }
 0x2d1   : > { %p14_p4 = scmp.ge.s32.totalorder %s17_s24, 4  }
 0x2d3   :  { %16 = sbr.rel (!%p14_p4) target bundleno = 1 (0x1), region = 81 }

</bundles_post_ra>
